<compile_context>
chip_gen: v7x
topology: tpu7x:2x2x1
jax: 0.10.0
libtpu: 0.0.40
codegen_flags: <defaults>
</compile_context>

<pallas_src>
import functools

import numpy as np
import jax
import jax.numpy as jnp
from jax import lax
from jax.experimental import pallas as pl
from jax.experimental.pallas import tpu as pltpu

PAD = 0
LN_EPS = 1e-5
NEG_INF = -1e9


# ---------------------------------------------------------------------------
# sinusoid position encoding table (same formula as the PyTorch helper)
# ---------------------------------------------------------------------------
def get_sinusoid_encoding_table(n_position, d_hid):
    pos = np.arange(n_position, dtype=np.float64)[:, None]
    hid = np.arange(d_hid, dtype=np.float64)[None, :]
    angle = pos / np.power(10000.0, 2.0 * (hid // 2) / d_hid)
    table = np.array(angle)
    table[:, 0::2] = np.sin(table[:, 0::2])
    table[:, 1::2] = np.cos(table[:, 1::2])
    return jnp.asarray(table, jnp.float32)


# ---------------------------------------------------------------------------
# helpers used inside the kernel
# ---------------------------------------------------------------------------
def _layer_norm(x, g, b):
    mu = jnp.mean(x, axis=-1, keepdims=True)
    var = jnp.mean((x - mu) ** 2, axis=-1, keepdims=True)
    return (x - mu) * lax.rsqrt(var + LN_EPS) * g + b


def _conv1d_same(a3, w_ref, kk):
    """'same'-padded 1-D conv over the sequence axis as kk accumulated matmuls.

    a3:          (TB, L, C) f32 activation
    w_ref[0, t]: (C, F)     bf16 tap weight
    returns      (TB*L, F)  f32

    Each tap is a shifted copy of the activation (pltpu.roll along L per sequence, so no
    cross-batch leakage) masked with ONE hoisted iota validity mask, then a full-M matmul
    accumulated in f32.  No (L, kk*C) lane-concat relayout, no extra bf16 copies.
    """
    TB, L, C = a3.shape
    N = TB * L
    bf16, f32 = jnp.bfloat16, jnp.float32
    pad = (kk - 1) // 2
    if kk == 1:
        return jnp.dot(a3.reshape(N, C).astype(bf16), w_ref[0, 0],
                       preferred_element_type=f32)
    rows = lax.broadcasted_iota(jnp.int32, a3.shape, 1)   # built once for all taps
    acc = None
    for t in range(kk):
        off = t - pad
        if off == 0:
            tap = a3
        else:
            rolled = pltpu.roll(a3, shift=(-off) % L, axis=1)
            valid = jnp.logical_and(rows + off >= 0, rows + off < L)
            tap = jnp.where(valid, rolled, 0.0)
        d = jnp.dot(tap.reshape(N, C).astype(bf16), w_ref[0, t],
                    preferred_element_type=f32)
        acc = d if acc is None else acc + d
    return acc


# ---------------------------------------------------------------------------
# Pallas kernel: whole encoder stack; grid = (B // TB, n_layers)
# Activation is carried across the layer axis in the resident output block.
# ---------------------------------------------------------------------------
def encoder_stack_kernel(x_ref, kbias_ref, qkeep_ref,
                         wqkv_ref, wo_ref, w1_ref, w2_ref, vecd_ref, veci_ref,
                         o_ref, *, n_head, d_k, d_v, k1, k2):
    layer = pl.program_id(1)
    bf16, f32 = jnp.bfloat16, jnp.float32
    TB, L, D = o_ref.shape
    N = TB * L
    HD = n_head * d_k
    scale = 1.0 / float(np.sqrt(d_k))

    # Seed the resident activation (output block) with emb+pos at the first layer.
    @pl.when(layer == 0)
    def _():
        o_ref[...] = x_ref[...]

    x3 = o_ref[...]                                 # (TB, L, D) f32, carried across layers
    x2 = x3.reshape(N, D)                           # flattened M dim for all dense matmuls
    qkeep = qkeep_ref[...]                          # (TB, L, 1)  1.0 at valid query rows
    kbias = kbias_ref[...]                          # (TB, 1, L)  additive key mask (0/-1e9)

    # packed small vectors: [bq, bk, bv, bo, ln1g, ln1b, b2, ln2g, ln2b]
    vec = vecd_ref[0]                               # (9, D) f32
    bq, bk, bv = vec[0:1], vec[1:2], vec[2:3]
    bo, ln1g, ln1b = vec[3:4], vec[4:5], vec[5:6]
    b2, ln2g, ln2b = vec[6:7], vec[7:8], vec[8:9]
    b1 = veci_ref[0]                                # (1, d_inner) f32

    # ---------------- multi-head self-attention ----------------
    # fused QKV: one (TB*L, D) @ (D, 3*HD) bf16 MXU matmul, f32 accumulation
    qkv = jnp.dot(x2.astype(bf16), wqkv_ref[0], preferred_element_type=f32)
    q = qkv[:, 0 * HD:1 * HD] + bq
    k = qkv[:, 1 * HD:2 * HD] + bk
    v = qkv[:, 2 * HD:3 * HD] + bv

    # TODO(synk): for production L, replace the per-batch (H, L, L) score tensor with a
    # KV-tile grid axis + online softmax (flash style) before L grows past ~256.
    ctx = []
    for b in range(TB):                             # static unroll over the batch tile
        qb = q[b * L:(b + 1) * L]
        kb = k[b * L:(b + 1) * L]
        vb = v[b * L:(b + 1) * L]
        qh = jnp.stack([qb[:, h * d_k:(h + 1) * d_k] for h in range(n_head)], 0).astype(bf16)
        kh = jnp.stack([kb[:, h * d_k:(h + 1) * d_k] for h in range(n_head)], 0).astype(bf16)
        vh = jnp.stack([vb[:, h * d_v:(h + 1) * d_v] for h in range(n_head)], 0).astype(bf16)

        s = jnp.einsum('hld,hmd->hlm', qh, kh, preferred_element_type=f32) * scale
        s = s + kbias[b]                            # (1, L) broadcast over (H, L, L)
        s = s - jnp.max(s, axis=-1, keepdims=True)
        p = jnp.exp(s)
        p = p * pl.reciprocal(jnp.sum(p, axis=-1, keepdims=True), approx=True)

        ob = jnp.einsum('hlm,hmd->hld', p.astype(bf16), vh,
                        preferred_element_type=f32)                    # (H, L, dv)
        ctx.append(jnp.concatenate([ob[h] for h in range(n_head)], axis=-1))   # (L, HD)
    ctx2 = jnp.concatenate(ctx, axis=0)             # (TB*L, HD)

    # ONE full-K output projection matmul (wo packed as (HD, D))
    attn = jnp.dot(ctx2.astype(bf16), wo_ref[0], preferred_element_type=f32) + bo
    attn = _layer_norm(attn + x2, ln1g, ln1b)
    attn3 = attn.reshape(TB, L, D) * qkeep          # masked_fill after attention

    # ---------------- position-wise conv feed-forward ----------------
    h1 = jnp.maximum(_conv1d_same(attn3, w1_ref, k1) + b1, 0.0)        # (TB*L, d_inner)
    h13 = h1.reshape(TB, L, h1.shape[-1])
    y = _conv1d_same(h13, w2_ref, k2) + b2                             # (TB*L, D)
    y3 = _layer_norm(y.reshape(TB, L, D) + attn3, ln2g, ln2b) * qkeep  # masked_fill after FFN

    o_ref[...] = y3                                 # carried to the next layer / final out


# ---------------------------------------------------------------------------
# wrapper: parameter packing + pallas_call
# ---------------------------------------------------------------------------
def pack_params(layer_params):
    wqkv, wo, w1, w2, vecd, veci = [], [], [], [], [], []
    for p in layer_params:
        wqkv.append(jnp.concatenate([p["wq"], p["wk"], p["wv"]], axis=1))   # (D, 3*HD)
        wo.append(p["wo"])                                                  # (HD, D)
        w1.append(p["w1"])                                                  # (k1, D, d_inner)
        w2.append(p["w2"])                                                  # (k2, d_inner, D)
        vecd.append(jnp.concatenate([p["bq"], p["bk"], p["bv"], p["bo"],
                                     p["ln1g"], p["ln1b"], p["b2"],
                                     p["ln2g"], p["ln2b"]], axis=0))        # (9, D)
        veci.append(p["b1"])                                                # (1, d_inner)
    return dict(
        wqkv=jnp.stack(wqkv).astype(jnp.bfloat16),
        wo=jnp.stack(wo).astype(jnp.bfloat16),
        w1=jnp.stack(w1).astype(jnp.bfloat16),
        w2=jnp.stack(w2).astype(jnp.bfloat16),
        vecD=jnp.stack(vecd).astype(jnp.float32),
        vecI=jnp.stack(veci).astype(jnp.float32),
    )


def encoder_pallas(x, kbias, qkeep, packed, *, n_head, d_k, d_v, k1, k2, batch_tile):
    B, L, D = x.shape
    n_layers, _, three_hd = packed["wqkv"].shape
    HD = n_head * d_k
    d_inner = packed["w1"].shape[-1]
    assert HD == D and n_head * d_v == D, "module defines d_k = d_v = d_model // n_head"
    assert three_hd == 3 * HD

    tb = max(1, min(batch_tile, B))
    while B % tb:           # largest divisor of B not exceeding the requested tile
        tb -= 1
    grid = (B // tb, n_layers)

    kern = functools.partial(encoder_stack_kernel, n_head=n_head, d_k=d_k,
                             d_v=d_v, k1=k1, k2=k2)

    # Activations / masks indexed by the batch-tile axis (constant across the layer axis
    # -> one DMA per batch tile); weights indexed by layer (double-buffered prefetch of
    # the next layer's weights, amortized over TB batch elements).
    in_specs = [
        pl.BlockSpec((tb, L, D), lambda b, l: (b, 0, 0)),              # emb+pos (layer-0 seed)
        pl.BlockSpec((tb, 1, L), lambda b, l: (b, 0, 0)),              # additive key mask
        pl.BlockSpec((tb, L, 1), lambda b, l: (b, 0, 0)),              # query keep mask
        pl.BlockSpec((1, D, 3 * HD), lambda b, l: (l, 0, 0)),          # fused QKV weight
        pl.BlockSpec((1, HD, D), lambda b, l: (l, 0, 0)),              # out-proj weight
        pl.BlockSpec((1, k1, D, d_inner), lambda b, l: (l, 0, 0, 0)),  # conv1 per-tap weight
        pl.BlockSpec((1, k2, d_inner, D), lambda b, l: (l, 0, 0, 0)),  # conv2 per-tap weight
        pl.BlockSpec((1, 9, D), lambda b, l: (l, 0, 0)),               # packed biases / LN
        pl.BlockSpec((1, 1, d_inner), lambda b, l: (l, 0, 0)),         # conv1 bias
    ]
    # out block ignores the layer axis -> stays resident in VMEM across layers (carry),
    # written back to HBM once per batch tile.
    out_spec = pl.BlockSpec((tb, L, D), lambda b, l: (b, 0, 0))

    return pl.pallas_call(
        kern,
        out_shape=jax.ShapeDtypeStruct((B, L, D), jnp.float32),
        grid=grid,
        in_specs=in_specs,
        out_specs=out_spec,
        compiler_params=pltpu.CompilerParams(
            dimension_semantics=("parallel", "arbitrary"),
            vmem_limit_bytes=48 * 1024 * 1024,     # fits v7x's 64 MiB VMEM; raise on v5e/v6e
        ),
    )(x, kbias, qkeep, packed["wqkv"], packed["wo"], packed["w1"], packed["w2"],
      packed["vecD"], packed["vecI"])


def encoder_forward(src_seq, mask, emb_table, pos_table, layer_params,
                    *, n_head, d_k, d_v, k1, k2, batch_tile=8):
    B, L = src_seq.shape
    # TODO(synk): the PyTorch forward rebuilds the sinusoid table on the fly when
    # L > max_seq_len (inference-only branch); here we assume L <= max_seq_len.
    x = (emb_table[src_seq] + pos_table[None, :L, :]).astype(jnp.float32)
    kbias = jnp.where(mask, NEG_INF, 0.0).astype(jnp.float32)[:, None, :]   # (B, 1, L)
    qkeep = jnp.where(mask, 0.0, 1.0).astype(jnp.float32)[:, :, None]       # (B, L, 1)
    packed = pack_params(layer_params)
    return encoder_pallas(x, kbias, qkeep, packed, n_head=n_head, d_k=d_k, d_v=d_v,
                          k1=k1, k2=k2, batch_tile=batch_tile)


# ---------------------------------------------------------------------------
# Pure-JAX reference (PyTorch eval-mode semantics; matmul operands cast to bf16
# with f32 accumulation to mirror the kernel's intentional MXU precision).
# ---------------------------------------------------------------------------
def encoder_reference(src_seq, mask, emb_table, pos_table, layer_params,
                      *, n_head, d_k, d_v, k1, k2):
    B, L = src_seq.shape
    x = emb_table[src_seq] + pos_table[None, :L, :]
    mkey = mask[:, None, :]
    mq = mask[:, :, None]
    bf = lambda a: a.astype(jnp.bfloat16)
    f32 = jnp.float32
    for p in layer_params:
        q = jnp.einsum("bld,de->ble", bf(x), bf(p["wq"]), preferred_element_type=f32) + p["bq"]
        k = jnp.einsum("bld,de->ble", bf(x), bf(p["wk"]), preferred_element_type=f32) + p["bk"]
        v = jnp.einsum("bld,de->ble", bf(x), bf(p["wv"]), preferred_element_type=f32) + p["bv"]
        q = q.reshape(B, L, n_head, d_k)
        k = k.reshape(B, L, n_head, d_k)
        v = v.reshape(B, L, n_head, d_v)
        s = jnp.einsum("blhd,bmhd->bhlm", bf(q), bf(k),
                       preferred_element_type=f32) / np.sqrt(d_k)
        s = jnp.where(mkey[:, None, :, :], NEG_INF, s)
        a = jax.nn.softmax(s, axis=-1)
        o = jnp.einsum("bhlm,bmhd->blhd", bf(a), bf(v),
                       preferred_element_type=f32).reshape(B, L, n_head * d_v)
        o = jnp.einsum("ble,ed->bld", bf(o), bf(p["wo"]), preferred_element_type=f32) + p["bo"]
        o = _layer_norm(o + x, p["ln1g"], p["ln1b"])
        o = jnp.where(mq, 0.0, o)
        res = o
        pad1 = (k1 - 1) // 2
        xt = jnp.pad(o, ((0, 0), (pad1, pad1), (0, 0)))
        h = sum(jnp.einsum("bld,df->blf", bf(xt[:, t:t + L]), bf(p["w1"][t]),
                           preferred_element_type=f32) for t in range(k1)) + p["b1"]
        h = jnp.maximum(h, 0.0)
        pad2 = (k2 - 1) // 2
        ht = jnp.pad(h, ((0, 0), (pad2, pad2), (0, 0)))
        y = sum(jnp.einsum("blf,fd->bld", bf(ht[:, t:t + L]), bf(p["w2"][t]),
                           preferred_element_type=f32) for t in range(k2)) + p["b2"]
        y = _layer_norm(y + res, p["ln2g"], p["ln2b"])
        x = jnp.where(mq, 0.0, y)
    return x


# ---------------------------------------------------------------------------
# deterministic parameter init
# ---------------------------------------------------------------------------
def init_layer_params(key, n_layers, D, H, d_k, d_v, d_inner, k1, k2):
    layers = []
    for i in range(n_layers):
        ks = jax.random.split(jax.random.fold_in(key, i), 10)
        nrm = lambda kk, shape, s=0.05: jax.random.normal(kk, shape, jnp.float32) * s
        layers.append(dict(
            wq=nrm(ks[0], (D, H * d_k)), bq=nrm(ks[1], (1, H * d_k)),
            wk=nrm(ks[2], (D, H * d_k)), bk=jnp.zeros((1, H * d_k), jnp.float32),
            wv=nrm(ks[3], (D, H * d_v)), bv=jnp.zeros((1, H * d_v), jnp.float32),
            wo=nrm(ks[4], (H * d_v, D)), bo=nrm(ks[5], (1, D)),
            ln1g=jnp.ones((1, D), jnp.float32), ln1b=jnp.zeros((1, D), jnp.float32),
            w1=nrm(ks[6], (k1, D, d_inner)), b1=nrm(ks[7], (1, d_inner)),
            w2=nrm(ks[8], (k2, d_inner, D)), b2=nrm(ks[9], (1, D)),
            ln2g=jnp.ones((1, D), jnp.float32), ln2b=jnp.zeros((1, D), jnp.float32),
        ))
    return layers


if __name__ == "__main__":
    # small config consistent with the module
    B, L = 4, 8                 # batch, seq (L kept a multiple of 8)
    D, H = 32, 2                # encoder_hidden, encoder_head
    n_layers = 2                # encoder_layer
    d_inner = 64                # conv_filter_size
    k1, k2 = 3, 1               # conv_kernel_size (odd, "same" padding)
    d_k = d_v = D // H
    vocab = 40                  # len(symbols) + 1
    max_seq_len = 16
    batch_tile = 2              # TB: batch grid extent = B/TB = 2 (feeds both TCs on v7x)

    key = jax.random.PRNGKey(0)
    k_emb, k_seq, k_par = jax.random.split(key, 3)

    emb_table = jax.random.normal(k_emb, (vocab, D), jnp.float32) * 0.05
    emb_table = emb_table.at[PAD].set(0.0)          # padding_idx = PAD
    pos_table = get_sinusoid_encoding_table(max_seq_len + 1, D)

    lengths = jnp.array([8, 5, 8, 3], jnp.int32)    # some sequences are padded
    src_seq = jax.random.randint(k_seq, (B, L), 1, vocab)
    valid = jnp.arange(L)[None, :] < lengths[:, None]
    src_seq = jnp.where(valid, src_seq, PAD).astype(jnp.int32)
    mask = src_seq == PAD                           # True at padded positions

    layer_params = init_layer_params(k_par, n_layers, D, H, d_k, d_v, d_inner, k1, k2)

    out = encoder_forward(src_seq, mask, emb_table, pos_table, layer_params,
                          n_head=H, d_k=d_k, d_v=d_v, k1=k1, k2=k2,
                          batch_tile=batch_tile)
    out = jax.block_until_ready(out)

    ref = encoder_reference(src_seq, mask, emb_table, pos_table, layer_params,
                            n_head=H, d_k=d_k, d_v=d_v, k1=k1, k2=k2)
    ref = jax.block_until_ready(ref)

    assert out.shape == (B, L, D)
    assert bool(jnp.all(jnp.isfinite(out)))
    # tolerance covers bf16 MXU operands (mirrored in the reference), reduction-order
    # differences and the EUP approximate reciprocal in the softmax normalization.
    np.testing.assert_allclose(np.asarray(out), np.asarray(ref), rtol=1e-2, atol=1e-2)
    print("KERNEL_OK")
</pallas_src>

<mosaic_0001>
module attributes {stable_mosaic.version = 11 : i64} {
  func.func @encoder_stack_kernel(%arg0: i32, %arg1: i32, %arg2: memref<2x8x32xf32, #tpu.memory_space<vmem>>, %arg3: memref<2x1x8xf32, #tpu.memory_space<vmem>>, %arg4: memref<2x8x1xf32, #tpu.memory_space<vmem>>, %arg5: memref<1x32x96xbf16, #tpu.memory_space<vmem>>, %arg6: memref<1x32x32xbf16, #tpu.memory_space<vmem>>, %arg7: memref<1x3x32x64xbf16, #tpu.memory_space<vmem>>, %arg8: memref<1x1x64x32xbf16, #tpu.memory_space<vmem>>, %arg9: memref<1x9x32xf32, #tpu.memory_space<vmem>>, %arg10: memref<1x1x64xf32, #tpu.memory_space<vmem>>, %arg11: memref<2x8x32xf32, #tpu.memory_space<vmem>>) attributes {dimension_semantics = [#tpu.dimension_semantics<parallel>, #tpu.dimension_semantics<arbitrary>], iteration_bounds = array<i64: 2, 2>, scalar_prefetch = 0 : i64, scratch_operands = 0 : i64, tpu.core_type = #tpu.core_type<tc>, window_params = [{transform_indices = @transform_0, window_bounds = array<i64: 2, 8, 32>}, {transform_indices = @transform_1, window_bounds = array<i64: 2, 1, 8>}, {transform_indices = @transform_2, window_bounds = array<i64: 2, 8, 1>}, {transform_indices = @transform_3, window_bounds = array<i64: 1, 32, 96>}, {transform_indices = @transform_4, window_bounds = array<i64: 1, 32, 32>}, {transform_indices = @transform_5, window_bounds = array<i64: 1, 3, 32, 64>}, {transform_indices = @transform_6, window_bounds = array<i64: 1, 1, 64, 32>}, {transform_indices = @transform_7, window_bounds = array<i64: 1, 9, 32>}, {transform_indices = @transform_8, window_bounds = array<i64: 1, 1, 64>}, {transform_indices = @transform_9, window_bounds = array<i64: 2, 8, 32>}]} {
    %c0_i32 = arith.constant 0 : i32
    %0 = arith.cmpi eq, %arg1, %c0_i32 : i32
    %1 = arith.extui %0 : i1 to i32
    %c0_i32_0 = arith.constant 0 : i32
    %2 = arith.cmpi ne, %1, %c0_i32_0 : i32
    scf.if %2 {
      %c0_72 = arith.constant 0 : index
      %c0_73 = arith.constant 0 : index
      %c0_74 = arith.constant 0 : index
      %241 = vector.load %arg2[%c0_72, %c0_73, %c0_74] : memref<2x8x32xf32, #tpu.memory_space<vmem>>, vector<2x8x32xf32>
      %c0_75 = arith.constant 0 : index
      %c0_76 = arith.constant 0 : index
      %c0_77 = arith.constant 0 : index
      %242 = vector.load %arg11[%c0_75, %c0_76, %c0_77] : memref<2x8x32xf32, #tpu.memory_space<vmem>>, vector<2x8x32xf32>
      tpu.vector_store %arg11[%c0_75, %c0_76, %c0_77], %241 {strides = array<i32>} : memref<2x8x32xf32, #tpu.memory_space<vmem>>, vector<2x8x32xf32>,
    } else {
    }
    %c0 = arith.constant 0 : index
    %c0_1 = arith.constant 0 : index
    %c0_2 = arith.constant 0 : index
    %3 = vector.load %arg11[%c0, %c0_1, %c0_2] : memref<2x8x32xf32, #tpu.memory_space<vmem>>, vector<2x8x32xf32>
    %4 = vector.shape_cast %3 : vector<2x8x32xf32> to vector<16x32xf32>
    %c0_3 = arith.constant 0 : index
    %c0_4 = arith.constant 0 : index
    %c0_5 = arith.constant 0 : index
    %5 = vector.load %arg4[%c0_3, %c0_4, %c0_5] : memref<2x8x1xf32, #tpu.memory_space<vmem>>, vector<2x8x1xf32>
    %c0_6 = arith.constant 0 : index
    %c0_7 = arith.constant 0 : index
    %c0_8 = arith.constant 0 : index
    %6 = vector.load %arg3[%c0_6, %c0_7, %c0_8] : memref<2x1x8xf32, #tpu.memory_space<vmem>>, vector<2x1x8xf32>
    %c0_9 = arith.constant 0 : index
    %c0_10 = arith.constant 0 : index
    %c0_11 = arith.constant 0 : index
    %7 = vector.load %arg9[%c0_9, %c0_10, %c0_11] : memref<1x9x32xf32, #tpu.memory_space<vmem>>, vector<1x9x32xf32>
    %8 = vector.shape_cast %7 : vector<1x9x32xf32> to vector<9x32xf32>
    %9 = vector.extract_strided_slice %8 {offsets = [0, 0], sizes = [1, 32], strides = [1, 1]} : vector<9x32xf32> to vector<1x32xf32>
    %10 = vector.extract_strided_slice %8 {offsets = [1, 0], sizes = [1, 32], strides = [1, 1]} : vector<9x32xf32> to vector<1x32xf32>
    %11 = vector.extract_strided_slice %8 {offsets = [2, 0], sizes = [1, 32], strides = [1, 1]} : vector<9x32xf32> to vector<1x32xf32>
    %12 = vector.extract_strided_slice %8 {offsets = [3, 0], sizes = [1, 32], strides = [1, 1]} : vector<9x32xf32> to vector<1x32xf32>
    %13 = vector.extract_strided_slice %8 {offsets = [4, 0], sizes = [1, 32], strides = [1, 1]} : vector<9x32xf32> to vector<1x32xf32>
    %14 = vector.extract_strided_slice %8 {offsets = [5, 0], sizes = [1, 32], strides = [1, 1]} : vector<9x32xf32> to vector<1x32xf32>
    %15 = vector.extract_strided_slice %8 {offsets = [6, 0], sizes = [1, 32], strides = [1, 1]} : vector<9x32xf32> to vector<1x32xf32>
    %16 = vector.extract_strided_slice %8 {offsets = [7, 0], sizes = [1, 32], strides = [1, 1]} : vector<9x32xf32> to vector<1x32xf32>
    %17 = vector.extract_strided_slice %8 {offsets = [8, 0], sizes = [1, 32], strides = [1, 1]} : vector<9x32xf32> to vector<1x32xf32>
    %c0_12 = arith.constant 0 : index
    %c0_13 = arith.constant 0 : index
    %c0_14 = arith.constant 0 : index
    %18 = vector.load %arg10[%c0_12, %c0_13, %c0_14] : memref<1x1x64xf32, #tpu.memory_space<vmem>>, vector<1x1x64xf32>
    %19 = vector.shape_cast %18 : vector<1x1x64xf32> to vector<1x64xf32>
    %20 = arith.truncf %4 : vector<16x32xf32> to vector<16x32xbf16>
    %c0_15 = arith.constant 0 : index
    %c0_16 = arith.constant 0 : index
    %c0_17 = arith.constant 0 : index
    %21 = vector.load %arg5[%c0_15, %c0_16, %c0_17] : memref<1x32x96xbf16, #tpu.memory_space<vmem>>, vector<1x32x96xbf16>
    %22 = vector.shape_cast %21 : vector<1x32x96xbf16> to vector<32x96xbf16>
    %cst = arith.constant dense<0.000000e+00> : vector<16x96xf32>
    %23 = tpu.matmul %20, %22, %cst {dimension_numbers = #tpu.dot_dimension_numbers<[1], [0], [0], [1], [0, 0, 1, 1], [], []>} : vector<16x32xbf16>, vector<32x96xbf16>, vector<16x96xf32> -> vector<16x96xf32>
    %24 = vector.extract_strided_slice %23 {offsets = [0, 0], sizes = [16, 32], strides = [1, 1]} : vector<16x96xf32> to vector<16x32xf32>
    %25 = vector.broadcast %9 : vector<1x32xf32> to vector<16x32xf32>
    %26 = arith.addf %24, %25 : vector<16x32xf32>
    %27 = vector.extract_strided_slice %23 {offsets = [0, 32], sizes = [16, 32], strides = [1, 1]} : vector<16x96xf32> to vector<16x32xf32>
    %28 = vector.broadcast %10 : vector<1x32xf32> to vector<16x32xf32>
    %29 = arith.addf %27, %28 : vector<16x32xf32>
    %30 = vector.extract_strided_slice %23 {offsets = [0, 64], sizes = [16, 32], strides = [1, 1]} : vector<16x96xf32> to vector<16x32xf32>
    %31 = vector.broadcast %11 : vector<1x32xf32> to vector<16x32xf32>
    %32 = arith.addf %30, %31 : vector<16x32xf32>
    %33 = vector.extract_strided_slice %26 {offsets = [0, 0], sizes = [8, 32], strides = [1, 1]} : vector<16x32xf32> to vector<8x32xf32>
    %34 = vector.extract_strided_slice %29 {offsets = [0, 0], sizes = [8, 32], strides = [1, 1]} : vector<16x32xf32> to vector<8x32xf32>
    %35 = vector.extract_strided_slice %32 {offsets = [0, 0], sizes = [8, 32], strides = [1, 1]} : vector<16x32xf32> to vector<8x32xf32>
    %36 = vector.extract_strided_slice %33 {offsets = [0, 0], sizes = [8, 16], strides = [1, 1]} : vector<8x32xf32> to vector<8x16xf32>
    %37 = vector.extract_strided_slice %33 {offsets = [0, 16], sizes = [8, 16], strides = [1, 1]} : vector<8x32xf32> to vector<8x16xf32>
    %38 = vector.shape_cast %36 : vector<8x16xf32> to vector<1x8x16xf32>
    %39 = vector.shape_cast %37 : vector<8x16xf32> to vector<1x8x16xf32>
    %40 = tpu.concatenate %38, %39 in 0 : vector<1x8x16xf32>, vector<1x8x16xf32> -> vector<2x8x16xf32>
    %41 = arith.truncf %40 : vector<2x8x16xf32> to vector<2x8x16xbf16>
    %42 = vector.extract_strided_slice %34 {offsets = [0, 0], sizes = [8, 16], strides = [1, 1]} : vector<8x32xf32> to vector<8x16xf32>
    %43 = vector.extract_strided_slice %34 {offsets = [0, 16], sizes = [8, 16], strides = [1, 1]} : vector<8x32xf32> to vector<8x16xf32>
    %44 = vector.shape_cast %42 : vector<8x16xf32> to vector<1x8x16xf32>
    %45 = vector.shape_cast %43 : vector<8x16xf32> to vector<1x8x16xf32>
    %46 = tpu.concatenate %44, %45 in 0 : vector<1x8x16xf32>, vector<1x8x16xf32> -> vector<2x8x16xf32>
    %47 = arith.truncf %46 : vector<2x8x16xf32> to vector<2x8x16xbf16>
    %48 = vector.extract_strided_slice %35 {offsets = [0, 0], sizes = [8, 16], strides = [1, 1]} : vector<8x32xf32> to vector<8x16xf32>
    %49 = vector.extract_strided_slice %35 {offsets = [0, 16], sizes = [8, 16], strides = [1, 1]} : vector<8x32xf32> to vector<8x16xf32>
    %50 = vector.shape_cast %48 : vector<8x16xf32> to vector<1x8x16xf32>
    %51 = vector.shape_cast %49 : vector<8x16xf32> to vector<1x8x16xf32>
    %52 = tpu.concatenate %50, %51 in 0 : vector<1x8x16xf32>, vector<1x8x16xf32> -> vector<2x8x16xf32>
    %53 = arith.truncf %52 : vector<2x8x16xf32> to vector<2x8x16xbf16>
    "tpu.trace_start"() <{level = 10 : i32, message = "hld,hmd->hlm"}> : () -> ()
    %cst_18 = arith.constant dense<0.000000e+00> : vector<2x8x8xf32>
    %54 = tpu.matmul %41, %47, %cst_18 {dimension_numbers = #tpu.dot_dimension_numbers<[2], [2], [1], [1], [0, 0, 0, 1, 1, 1], [0], [0]>} : vector<2x8x16xbf16>, vector<2x8x16xbf16>, vector<2x8x8xf32> -> vector<2x8x8xf32>
    "tpu.trace_stop"() : () -> ()
    %cst_19 = arith.constant 2.500000e-01 : f32
    %55 = vector.broadcast %cst_19 : f32 to vector<2x8x8xf32>
    %56 = arith.mulf %54, %55 : vector<2x8x8xf32>
    %57 = vector.extract_strided_slice %6 {offsets = [0, 0, 0], sizes = [1, 1, 8], strides = [1, 1, 1]} : vector<2x1x8xf32> to vector<1x1x8xf32>
    %58 = vector.shape_cast %57 : vector<1x1x8xf32> to vector<1x8xf32>
    %59 = vector.shape_cast %58 : vector<1x8xf32> to vector<1x1x8xf32>
    %60 = vector.broadcast %59 : vector<1x1x8xf32> to vector<2x8x8xf32>
    %61 = arith.addf %56, %60 : vector<2x8x8xf32>
    %cst_20 = arith.constant dense<0xFF800000> : vector<2x8xf32>
    %62 = vector.multi_reduction <maximumf>, %61, %cst_20 [2] : vector<2x8x8xf32> to vector<2x8xf32>
    %63 = vector.shape_cast %62 : vector<2x8xf32> to vector<2x8x1xf32>
    %64 = vector.broadcast %63 : vector<2x8x1xf32> to vector<2x8x8xf32>
    %65 = arith.subf %61, %64 : vector<2x8x8xf32>
    %66 = math.exp %65 : vector<2x8x8xf32>
    %cst_21 = arith.constant dense<0.000000e+00> : vector<2x8xf32>
    %67 = vector.multi_reduction <add>, %66, %cst_21 [2] : vector<2x8x8xf32> to vector<2x8xf32>
    %68 = vector.shape_cast %67 : vector<2x8xf32> to vector<2x8x1xf32>
    %69 = tpu.reciprocal %68 {approx = true} : vector<2x8x1xf32> -> vector<2x8x1xf32>
    %70 = vector.broadcast %69 : vector<2x8x1xf32> to vector<2x8x8xf32>
    %71 = arith.mulf %66, %70 : vector<2x8x8xf32>
    %72 = arith.truncf %71 : vector<2x8x8xf32> to vector<2x8x8xbf16>
    "tpu.trace_start"() <{level = 10 : i32, message = "hlm,hmd->hld"}> : () -> ()
    %cst_22 = arith.constant dense<0.000000e+00> : vector<2x8x16xf32>
    %73 = tpu.matmul %72, %53, %cst_22 {dimension_numbers = #tpu.dot_dimension_numbers<[2], [1], [1], [2], [0, 0, 0, 1, 1, 2], [0], [0]>} : vector<2x8x8xbf16>, vector<2x8x16xbf16>, vector<2x8x16xf32> -> vector<2x8x16xf32>
    "tpu.trace_stop"() : () -> ()
    %74 = vector.extract_strided_slice %73 {offsets = [0, 0, 0], sizes = [1, 8, 16], strides = [1, 1, 1]} : vector<2x8x16xf32> to vector<1x8x16xf32>
    %75 = vector.shape_cast %74 : vector<1x8x16xf32> to vector<8x16xf32>
    %76 = vector.extract_strided_slice %73 {offsets = [1, 0, 0], sizes = [1, 8, 16], strides = [1, 1, 1]} : vector<2x8x16xf32> to vector<1x8x16xf32>
    %77 = vector.shape_cast %76 : vector<1x8x16xf32> to vector<8x16xf32>
    %78 = tpu.concatenate %75, %77 in 1 : vector<8x16xf32>, vector<8x16xf32> -> vector<8x32xf32>
    %79 = vector.extract_strided_slice %26 {offsets = [8, 0], sizes = [8, 32], strides = [1, 1]} : vector<16x32xf32> to vector<8x32xf32>
    %80 = vector.extract_strided_slice %29 {offsets = [8, 0], sizes = [8, 32], strides = [1, 1]} : vector<16x32xf32> to vector<8x32xf32>
    %81 = vector.extract_strided_slice %32 {offsets = [8, 0], sizes = [8, 32], strides = [1, 1]} : vector<16x32xf32> to vector<8x32xf32>
    %82 = vector.extract_strided_slice %79 {offsets = [0, 0], sizes = [8, 16], strides = [1, 1]} : vector<8x32xf32> to vector<8x16xf32>
    %83 = vector.extract_strided_slice %79 {offsets = [0, 16], sizes = [8, 16], strides = [1, 1]} : vector<8x32xf32> to vector<8x16xf32>
    %84 = vector.shape_cast %82 : vector<8x16xf32> to vector<1x8x16xf32>
    %85 = vector.shape_cast %83 : vector<8x16xf32> to vector<1x8x16xf32>
    %86 = tpu.concatenate %84, %85 in 0 : vector<1x8x16xf32>, vector<1x8x16xf32> -> vector<2x8x16xf32>
    %87 = arith.truncf %86 : vector<2x8x16xf32> to vector<2x8x16xbf16>
    %88 = vector.extract_strided_slice %80 {offsets = [0, 0], sizes = [8, 16], strides = [1, 1]} : vector<8x32xf32> to vector<8x16xf32>
    %89 = vector.extract_strided_slice %80 {offsets = [0, 16], sizes = [8, 16], strides = [1, 1]} : vector<8x32xf32> to vector<8x16xf32>
    %90 = vector.shape_cast %88 : vector<8x16xf32> to vector<1x8x16xf32>
    %91 = vector.shape_cast %89 : vector<8x16xf32> to vector<1x8x16xf32>
    %92 = tpu.concatenate %90, %91 in 0 : vector<1x8x16xf32>, vector<1x8x16xf32> -> vector<2x8x16xf32>
    %93 = arith.truncf %92 : vector<2x8x16xf32> to vector<2x8x16xbf16>
    %94 = vector.extract_strided_slice %81 {offsets = [0, 0], sizes = [8, 16], strides = [1, 1]} : vector<8x32xf32> to vector<8x16xf32>
    %95 = vector.extract_strided_slice %81 {offsets = [0, 16], sizes = [8, 16], strides = [1, 1]} : vector<8x32xf32> to vector<8x16xf32>
    %96 = vector.shape_cast %94 : vector<8x16xf32> to vector<1x8x16xf32>
    %97 = vector.shape_cast %95 : vector<8x16xf32> to vector<1x8x16xf32>
    %98 = tpu.concatenate %96, %97 in 0 : vector<1x8x16xf32>, vector<1x8x16xf32> -> vector<2x8x16xf32>
    %99 = arith.truncf %98 : vector<2x8x16xf32> to vector<2x8x16xbf16>
    "tpu.trace_start"() <{level = 10 : i32, message = "hld,hmd->hlm"}> : () -> ()
    %cst_23 = arith.constant dense<0.000000e+00> : vector<2x8x8xf32>
    %100 = tpu.matmul %87, %93, %cst_23 {dimension_numbers = #tpu.dot_dimension_numbers<[2], [2], [1], [1], [0, 0, 0, 1, 1, 1], [0], [0]>} : vector<2x8x16xbf16>, vector<2x8x16xbf16>, vector<2x8x8xf32> -> vector<2x8x8xf32>
    "tpu.trace_stop"() : () -> ()
    %cst_24 = arith.constant 2.500000e-01 : f32
    %101 = vector.broadcast %cst_24 : f32 to vector<2x8x8xf32>
    %102 = arith.mulf %100, %101 : vector<2x8x8xf32>
    %103 = vector.extract_strided_slice %6 {offsets = [1, 0, 0], sizes = [1, 1, 8], strides = [1, 1, 1]} : vector<2x1x8xf32> to vector<1x1x8xf32>
    %104 = vector.shape_cast %103 : vector<1x1x8xf32> to vector<1x8xf32>
    %105 = vector.shape_cast %104 : vector<1x8xf32> to vector<1x1x8xf32>
    %106 = vector.broadcast %105 : vector<1x1x8xf32> to vector<2x8x8xf32>
    %107 = arith.addf %102, %106 : vector<2x8x8xf32>
    %cst_25 = arith.constant dense<0xFF800000> : vector<2x8xf32>
    %108 = vector.multi_reduction <maximumf>, %107, %cst_25 [2] : vector<2x8x8xf32> to vector<2x8xf32>
    %109 = vector.shape_cast %108 : vector<2x8xf32> to vector<2x8x1xf32>
    %110 = vector.broadcast %109 : vector<2x8x1xf32> to vector<2x8x8xf32>
    %111 = arith.subf %107, %110 : vector<2x8x8xf32>
    %112 = math.exp %111 : vector<2x8x8xf32>
    %cst_26 = arith.constant dense<0.000000e+00> : vector<2x8xf32>
    %113 = vector.multi_reduction <add>, %112, %cst_26 [2] : vector<2x8x8xf32> to vector<2x8xf32>
    %114 = vector.shape_cast %113 : vector<2x8xf32> to vector<2x8x1xf32>
    %115 = tpu.reciprocal %114 {approx = true} : vector<2x8x1xf32> -> vector<2x8x1xf32>
    %116 = vector.broadcast %115 : vector<2x8x1xf32> to vector<2x8x8xf32>
    %117 = arith.mulf %112, %116 : vector<2x8x8xf32>
    %118 = arith.truncf %117 : vector<2x8x8xf32> to vector<2x8x8xbf16>
    "tpu.trace_start"() <{level = 10 : i32, message = "hlm,hmd->hld"}> : () -> ()
    %cst_27 = arith.constant dense<0.000000e+00> : vector<2x8x16xf32>
    %119 = tpu.matmul %118, %99, %cst_27 {dimension_numbers = #tpu.dot_dimension_numbers<[2], [1], [1], [2], [0, 0, 0, 1, 1, 2], [0], [0]>} : vector<2x8x8xbf16>, vector<2x8x16xbf16>, vector<2x8x16xf32> -> vector<2x8x16xf32>
    "tpu.trace_stop"() : () -> ()
    %120 = vector.extract_strided_slice %119 {offsets = [0, 0, 0], sizes = [1, 8, 16], strides = [1, 1, 1]} : vector<2x8x16xf32> to vector<1x8x16xf32>
    %121 = vector.shape_cast %120 : vector<1x8x16xf32> to vector<8x16xf32>
    %122 = vector.extract_strided_slice %119 {offsets = [1, 0, 0], sizes = [1, 8, 16], strides = [1, 1, 1]} : vector<2x8x16xf32> to vector<1x8x16xf32>
    %123 = vector.shape_cast %122 : vector<1x8x16xf32> to vector<8x16xf32>
    %124 = tpu.concatenate %121, %123 in 1 : vector<8x16xf32>, vector<8x16xf32> -> vector<8x32xf32>
    %125 = tpu.concatenate %78, %124 in 0 : vector<8x32xf32>, vector<8x32xf32> -> vector<16x32xf32>
    %126 = arith.truncf %125 : vector<16x32xf32> to vector<16x32xbf16>
    %c0_28 = arith.constant 0 : index
    %c0_29 = arith.constant 0 : index
    %c0_30 = arith.constant 0 : index
    %127 = vector.load %arg6[%c0_28, %c0_29, %c0_30] : memref<1x32x32xbf16, #tpu.memory_space<vmem>>, vector<1x32x32xbf16>
    %128 = vector.shape_cast %127 : vector<1x32x32xbf16> to vector<32x32xbf16>
    %cst_31 = arith.constant dense<0.000000e+00> : vector<16x32xf32>
    %129 = tpu.matmul %126, %128, %cst_31 {dimension_numbers = #tpu.dot_dimension_numbers<[1], [0], [0], [1], [0, 0, 1, 1], [], []>} : vector<16x32xbf16>, vector<32x32xbf16>, vector<16x32xf32> -> vector<16x32xf32>
    %130 = vector.broadcast %12 : vector<1x32xf32> to vector<16x32xf32>
    %131 = arith.addf %129, %130 : vector<16x32xf32>
    %132 = arith.addf %131, %4 : vector<16x32xf32>
    %cst_32 = arith.constant dense<0.000000e+00> : vector<16xf32>
    %133 = vector.multi_reduction <add>, %132, %cst_32 [1] : vector<16x32xf32> to vector<16xf32>
    %134 = vector.shape_cast %133 : vector<16xf32> to vector<16x1xf32>
    %cst_33 = arith.constant 3.200000e+01 : f32
    %135 = vector.broadcast %cst_33 : f32 to vector<16x1xf32>
    %136 = arith.divf %134, %135 : vector<16x1xf32>
    %137 = vector.broadcast %136 : vector<16x1xf32> to vector<16x32xf32>
    %138 = arith.subf %132, %137 : vector<16x32xf32>
    %139 = arith.mulf %138, %138 : vector<16x32xf32>
    %cst_34 = arith.constant dense<0.000000e+00> : vector<16xf32>
    %140 = vector.multi_reduction <add>, %139, %cst_34 [1] : vector<16x32xf32> to vector<16xf32>
    %141 = vector.shape_cast %140 : vector<16xf32> to vector<16x1xf32>
    %cst_35 = arith.constant 3.200000e+01 : f32
    %142 = vector.broadcast %cst_35 : f32 to vector<16x1xf32>
    %143 = arith.divf %141, %142 : vector<16x1xf32>
    %144 = vector.broadcast %136 : vector<16x1xf32> to vector<16x32xf32>
    %145 = arith.subf %132, %144 : vector<16x32xf32>
    %cst_36 = arith.constant 9.99999974E-6 : f32
    %146 = vector.broadcast %cst_36 : f32 to vector<16x1xf32>
    %147 = arith.addf %143, %146 : vector<16x1xf32>
    %148 = math.rsqrt %147 : vector<16x1xf32>
    %149 = vector.broadcast %148 : vector<16x1xf32> to vector<16x32xf32>
    %150 = arith.mulf %145, %149 : vector<16x32xf32>
    %151 = vector.broadcast %13 : vector<1x32xf32> to vector<16x32xf32>
    %152 = arith.mulf %150, %151 : vector<16x32xf32>
    %153 = vector.broadcast %14 : vector<1x32xf32> to vector<16x32xf32>
    %154 = arith.addf %152, %153 : vector<16x32xf32>
    %155 = vector.shape_cast %154 : vector<16x32xf32> to vector<2x8x32xf32>
    %156 = vector.broadcast %5 : vector<2x8x1xf32> to vector<2x8x32xf32>
    %157 = arith.mulf %155, %156 : vector<2x8x32xf32>
    %158 = tpu.iota {dimensions = array<i32: 1>} : vector<2x8x32xi32>
    %c1_i32 = arith.constant 1 : i32
    %159 = tpu.dynamic_rotate %157 by %c1_i32 dim 1 : vector<2x8x32xf32>, i32 -> vector<2x8x32xf32>
    %c-1_i32 = arith.constant -1 : i32
    %160 = vector.broadcast %c-1_i32 : i32 to vector<2x8x32xi32>
    %161 = arith.addi %158, %160 : vector<2x8x32xi32>
    %c0_i32_37 = arith.constant 0 : i32
    %162 = vector.broadcast %c0_i32_37 : i32 to vector<2x8x32xi32>
    %163 = arith.cmpi sge, %161, %162 : vector<2x8x32xi32>
    %c-1_i32_38 = arith.constant -1 : i32
    %164 = vector.broadcast %c-1_i32_38 : i32 to vector<2x8x32xi32>
    %165 = arith.addi %158, %164 : vector<2x8x32xi32>
    %c8_i32 = arith.constant 8 : i32
    %166 = vector.broadcast %c8_i32 : i32 to vector<2x8x32xi32>
    %167 = arith.cmpi slt, %165, %166 : vector<2x8x32xi32>
    %168 = arith.andi %163, %167 : vector<2x8x32xi1>
    %cst_39 = arith.constant 0.000000e+00 : f32
    %169 = vector.broadcast %cst_39 : f32 to vector<2x8x32xf32>
    %170 = arith.select %168, %159, %169 : vector<2x8x32xi1>, vector<2x8x32xf32>
    %171 = vector.shape_cast %170 : vector<2x8x32xf32> to vector<16x32xf32>
    %172 = arith.truncf %171 : vector<16x32xf32> to vector<16x32xbf16>
    %c0_40 = arith.constant 0 : index
    %c0_41 = arith.constant 0 : index
    %c0_42 = arith.constant 0 : index
    %c0_43 = arith.constant 0 : index
    %173 = vector.load %arg7[%c0_40, %c0_41, %c0_42, %c0_43] : memref<1x3x32x64xbf16, #tpu.memory_space<vmem>>, vector<1x1x32x64xbf16>
    %174 = vector.shape_cast %173 : vector<1x1x32x64xbf16> to vector<32x64xbf16>
    %cst_44 = arith.constant dense<0.000000e+00> : vector<16x64xf32>
    %175 = tpu.matmul %172, %174, %cst_44 {dimension_numbers = #tpu.dot_dimension_numbers<[1], [0], [0], [1], [0, 0, 1, 1], [], []>} : vector<16x32xbf16>, vector<32x64xbf16>, vector<16x64xf32> -> vector<16x64xf32>
    %176 = vector.shape_cast %157 : vector<2x8x32xf32> to vector<16x32xf32>
    %177 = arith.truncf %176 : vector<16x32xf32> to vector<16x32xbf16>
    %c0_45 = arith.constant 0 : index
    %c1 = arith.constant 1 : index
    %c0_46 = arith.constant 0 : index
    %c0_47 = arith.constant 0 : index
    %178 = vector.load %arg7[%c0_45, %c1, %c0_46, %c0_47] : memref<1x3x32x64xbf16, #tpu.memory_space<vmem>>, vector<1x1x32x64xbf16>
    %179 = vector.shape_cast %178 : vector<1x1x32x64xbf16> to vector<32x64xbf16>
    %cst_48 = arith.constant dense<0.000000e+00> : vector<16x64xf32>
    %180 = tpu.matmul %177, %179, %cst_48 {dimension_numbers = #tpu.dot_dimension_numbers<[1], [0], [0], [1], [0, 0, 1, 1], [], []>} : vector<16x32xbf16>, vector<32x64xbf16>, vector<16x64xf32> -> vector<16x64xf32>
    %181 = arith.addf %175, %180 : vector<16x64xf32>
    %c7_i32 = arith.constant 7 : i32
    %182 = tpu.dynamic_rotate %157 by %c7_i32 dim 1 : vector<2x8x32xf32>, i32 -> vector<2x8x32xf32>
    %c1_i32_49 = arith.constant 1 : i32
    %183 = vector.broadcast %c1_i32_49 : i32 to vector<2x8x32xi32>
    %184 = arith.addi %158, %183 : vector<2x8x32xi32>
    %c0_i32_50 = arith.constant 0 : i32
    %185 = vector.broadcast %c0_i32_50 : i32 to vector<2x8x32xi32>
    %186 = arith.cmpi sge, %184, %185 : vector<2x8x32xi32>
    %c1_i32_51 = arith.constant 1 : i32
    %187 = vector.broadcast %c1_i32_51 : i32 to vector<2x8x32xi32>
    %188 = arith.addi %158, %187 : vector<2x8x32xi32>
    %c8_i32_52 = arith.constant 8 : i32
    %189 = vector.broadcast %c8_i32_52 : i32 to vector<2x8x32xi32>
    %190 = arith.cmpi slt, %188, %189 : vector<2x8x32xi32>
    %191 = arith.andi %186, %190 : vector<2x8x32xi1>
    %cst_53 = arith.constant 0.000000e+00 : f32
    %192 = vector.broadcast %cst_53 : f32 to vector<2x8x32xf32>
    %193 = arith.select %191, %182, %192 : vector<2x8x32xi1>, vector<2x8x32xf32>
    %194 = vector.shape_cast %193 : vector<2x8x32xf32> to vector<16x32xf32>
    %195 = arith.truncf %194 : vector<16x32xf32> to vector<16x32xbf16>
    %c0_54 = arith.constant 0 : index
    %c2 = arith.constant 2 : index
    %c0_55 = arith.constant 0 : index
    %c0_56 = arith.constant 0 : index
    %196 = vector.load %arg7[%c0_54, %c2, %c0_55, %c0_56] : memref<1x3x32x64xbf16, #tpu.memory_space<vmem>>, vector<1x1x32x64xbf16>
    %197 = vector.shape_cast %196 : vector<1x1x32x64xbf16> to vector<32x64xbf16>
    %cst_57 = arith.constant dense<0.000000e+00> : vector<16x64xf32>
    %198 = tpu.matmul %195, %197, %cst_57 {dimension_numbers = #tpu.dot_dimension_numbers<[1], [0], [0], [1], [0, 0, 1, 1], [], []>} : vector<16x32xbf16>, vector<32x64xbf16>, vector<16x64xf32> -> vector<16x64xf32>
    %199 = arith.addf %181, %198 : vector<16x64xf32>
    %200 = vector.broadcast %19 : vector<1x64xf32> to vector<16x64xf32>
    %201 = arith.addf %199, %200 : vector<16x64xf32>
    %cst_58 = arith.constant 0.000000e+00 : f32
    %202 = vector.broadcast %cst_58 : f32 to vector<16x64xf32>
    %203 = arith.maximumf %201, %202 : vector<16x64xf32>
    %204 = vector.shape_cast %203 : vector<16x64xf32> to vector<2x8x64xf32>
    %205 = vector.shape_cast %204 : vector<2x8x64xf32> to vector<16x64xf32>
    %206 = arith.truncf %205 : vector<16x64xf32> to vector<16x64xbf16>
    %c0_59 = arith.constant 0 : index
    %c0_60 = arith.constant 0 : index
    %c0_61 = arith.constant 0 : index
    %c0_62 = arith.constant 0 : index
    %207 = vector.load %arg8[%c0_59, %c0_60, %c0_61, %c0_62] : memref<1x1x64x32xbf16, #tpu.memory_space<vmem>>, vector<1x1x64x32xbf16>
    %208 = vector.shape_cast %207 : vector<1x1x64x32xbf16> to vector<64x32xbf16>
    %cst_63 = arith.constant dense<0.000000e+00> : vector<16x32xf32>
    %209 = tpu.matmul %206, %208, %cst_63 {dimension_numbers = #tpu.dot_dimension_numbers<[1], [0], [0], [1], [0, 0, 1, 1], [], []>} : vector<16x64xbf16>, vector<64x32xbf16>, vector<16x32xf32> -> vector<16x32xf32>
    %210 = vector.broadcast %15 : vector<1x32xf32> to vector<16x32xf32>
    %211 = arith.addf %209, %210 : vector<16x32xf32>
    %212 = vector.shape_cast %211 : vector<16x32xf32> to vector<2x8x32xf32>
    %213 = arith.addf %212, %157 : vector<2x8x32xf32>
    %cst_64 = arith.constant dense<0.000000e+00> : vector<2x8xf32>
    %214 = vector.multi_reduction <add>, %213, %cst_64 [2] : vector<2x8x32xf32> to vector<2x8xf32>
    %215 = vector.shape_cast %214 : vector<2x8xf32> to vector<2x8x1xf32>
    %cst_65 = arith.constant 3.200000e+01 : f32
    %216 = vector.broadcast %cst_65 : f32 to vector<2x8x1xf32>
    %217 = arith.divf %215, %216 : vector<2x8x1xf32>
    %218 = vector.broadcast %217 : vector<2x8x1xf32> to vector<2x8x32xf32>
    %219 = arith.subf %213, %218 : vector<2x8x32xf32>
    %220 = arith.mulf %219, %219 : vector<2x8x32xf32>
    %cst_66 = arith.constant dense<0.000000e+00> : vector<2x8xf32>
    %221 = vector.multi_reduction <add>, %220, %cst_66 [2] : vector<2x8x32xf32> to vector<2x8xf32>
    %222 = vector.shape_cast %221 : vector<2x8xf32> to vector<2x8x1xf32>
    %cst_67 = arith.constant 3.200000e+01 : f32
    %223 = vector.broadcast %cst_67 : f32 to vector<2x8x1xf32>
    %224 = arith.divf %222, %223 : vector<2x8x1xf32>
    %225 = vector.broadcast %217 : vector<2x8x1xf32> to vector<2x8x32xf32>
    %226 = arith.subf %213, %225 : vector<2x8x32xf32>
    %cst_68 = arith.constant 9.99999974E-6 : f32
    %227 = vector.broadcast %cst_68 : f32 to vector<2x8x1xf32>
    %228 = arith.addf %224, %227 : vector<2x8x1xf32>
    %229 = math.rsqrt %228 : vector<2x8x1xf32>
    %230 = vector.broadcast %229 : vector<2x8x1xf32> to vector<2x8x32xf32>
    %231 = arith.mulf %226, %230 : vector<2x8x32xf32>
    %232 = vector.shape_cast %16 : vector<1x32xf32> to vector<1x1x32xf32>
    %233 = vector.broadcast %232 : vector<1x1x32xf32> to vector<2x8x32xf32>
    %234 = arith.mulf %231, %233 : vector<2x8x32xf32>
    %235 = vector.shape_cast %17 : vector<1x32xf32> to vector<1x1x32xf32>
    %236 = vector.broadcast %235 : vector<1x1x32xf32> to vector<2x8x32xf32>
    %237 = arith.addf %234, %236 : vector<2x8x32xf32>
    %238 = vector.broadcast %5 : vector<2x8x1xf32> to vector<2x8x32xf32>
    %239 = arith.mulf %237, %238 : vector<2x8x32xf32>
    %c0_69 = arith.constant 0 : index
    %c0_70 = arith.constant 0 : index
    %c0_71 = arith.constant 0 : index
    %240 = vector.load %arg11[%c0_69, %c0_70, %c0_71] : memref<2x8x32xf32, #tpu.memory_space<vmem>>, vector<2x8x32xf32>
    tpu.vector_store %arg11[%c0_69, %c0_70, %c0_71], %239 {strides = array<i32>} : memref<2x8x32xf32, #tpu.memory_space<vmem>>, vector<2x8x32xf32>,
    return
  }
  func.func @transform_0(%arg0: i32, %arg1: i32) -> (i32, i32, i32) {
    %c0_i32 = arith.constant 0 : i32
    %c0_i32_0 = arith.constant 0 : i32
    %c0_i32_1 = arith.constant 0 : i32
    return %arg0, %c0_i32, %c0_i32_0 : i32, i32, i32
  }
  func.func @transform_1(%arg0: i32, %arg1: i32) -> (i32, i32, i32) {
    %c0_i32 = arith.constant 0 : i32
    %c0_i32_0 = arith.constant 0 : i32
    %c0_i32_1 = arith.constant 0 : i32
    return %arg0, %c0_i32, %c0_i32_0 : i32, i32, i32
  }
  func.func @transform_2(%arg0: i32, %arg1: i32) -> (i32, i32, i32) {
    %c0_i32 = arith.constant 0 : i32
    %c0_i32_0 = arith.constant 0 : i32
    %c0_i32_1 = arith.constant 0 : i32
    return %arg0, %c0_i32, %c0_i32_0 : i32, i32, i32
  }
  func.func @transform_3(%arg0: i32, %arg1: i32) -> (i32, i32, i32) {
    %c0_i32 = arith.constant 0 : i32
    %c0_i32_0 = arith.constant 0 : i32
    %c0_i32_1 = arith.constant 0 : i32
    return %arg1, %c0_i32, %c0_i32_0 : i32, i32, i32
  }
  func.func @transform_4(%arg0: i32, %arg1: i32) -> (i32, i32, i32) {
    %c0_i32 = arith.constant 0 : i32
    %c0_i32_0 = arith.constant 0 : i32
    %c0_i32_1 = arith.constant 0 : i32
    return %arg1, %c0_i32, %c0_i32_0 : i32, i32, i32
  }
  func.func @transform_5(%arg0: i32, %arg1: i32) -> (i32, i32, i32, i32) {
    %c0_i32 = arith.constant 0 : i32
    %c0_i32_0 = arith.constant 0 : i32
    %c0_i32_1 = arith.constant 0 : i32
    %c0_i32_2 = arith.constant 0 : i32
    return %arg1, %c0_i32, %c0_i32_0, %c0_i32_1 : i32, i32, i32, i32
  }
  func.func @transform_6(%arg0: i32, %arg1: i32) -> (i32, i32, i32, i32) {
    %c0_i32 = arith.constant 0 : i32
    %c0_i32_0 = arith.constant 0 : i32
    %c0_i32_1 = arith.constant 0 : i32
    %c0_i32_2 = arith.constant 0 : i32
    return %arg1, %c0_i32, %c0_i32_0, %c0_i32_1 : i32, i32, i32, i32
  }
  func.func @transform_7(%arg0: i32, %arg1: i32) -> (i32, i32, i32) {
    %c0_i32 = arith.constant 0 : i32
    %c0_i32_0 = arith.constant 0 : i32
    %c0_i32_1 = arith.constant 0 : i32
    return %arg1, %c0_i32, %c0_i32_0 : i32, i32, i32
  }
  func.func @transform_8(%arg0: i32, %arg1: i32) -> (i32, i32, i32) {
    %c0_i32 = arith.constant 0 : i32
    %c0_i32_0 = arith.constant 0 : i32
    %c0_i32_1 = arith.constant 0 : i32
    return %arg1, %c0_i32, %c0_i32_0 : i32, i32, i32
  }
  func.func @transform_9(%arg0: i32, %arg1: i32) -> (i32, i32, i32) {
    %c0_i32 = arith.constant 0 : i32
    %c0_i32_0 = arith.constant 0 : i32
    %c0_i32_1 = arith.constant 0 : i32
    return %arg0, %c0_i32, %c0_i32_0 : i32, i32, i32
  }
}

</mosaic_0001>

<bundles_post_ra>
// kernel: tpu_custom_call.1
= control target key start
LH: loop header
LB: loop body
LE: loop exit
PB: predicated region body
PF: predicated region fallthrough
CT: control target
= control target key end

     0   :  { %s2856_s0 = inlined_call_operand.vmem [shape: f32[4,8,32], index: 0, kind: input, shape index: {}]   ;;  %s2857_s1 = inlined_call_operand.vmem [shape: f32[4,1,8], index: 1, kind: input, shape index: {}]   ;;  %s2858_s2 = inlined_call_operand.vmem [shape: f32[4,8,1], index: 2, kind: input, shape index: {}]   ;;  %s2859_s3 = inlined_call_operand.vmem [shape: bf16[2,32,96], index: 3, kind: input, shape index: {}]   ;;  %s2860_s4 = inlined_call_operand.hbm [shape: bf16[2,32,32], index: 4, kind: input, shape index: {}]   ;;  %s2861_s5 = inlined_call_operand.vmem [shape: bf16[2,3,32,64], index: 5, kind: input, shape index: {}]   ;;  %s2862_s6 = inlined_call_operand.vmem [shape: bf16[2,1,64,32], index: 6, kind: input, shape index: {}]   ;;  %s2863_s7 = inlined_call_operand.vmem [shape: f32[2,9,32], index: 7, kind: input, shape index: {}]   ;;  %s2864_s8 = inlined_call_operand.vmem [shape: f32[2,1,64], index: 8, kind: input, shape index: {}]   ;;  %s2865_s9 = inlined_call_operand.hbm [shape: f32[4,8,32], index: 9, kind: output, shape index: {}]  }
   0x1   :  { %2883 = sst [smem:[#allocation22_spill]] %s2856_s0 }
   0x2   :  { %2884 = sst [smem:[#allocation23_spill]] %s2857_s1 }
   0x3   :  { %2885 = sst [smem:[#allocation24_spill]] %s2860_s4 }
   0x4   :  { %2886 = sst [smem:[#allocation25_spill]] %s2865_s9 }
   0x5   :  { %14 = vsyncpa [#allocation3], 0 }
   0x6   :  { %16 = vsyncpa [#allocation3 + $0x1], 0 }
   0x7   :  { %17 = vsyncpa [#allocation4], 0 }
   0x8   :  { %19 = vsyncpa [#allocation4 + $0x1], 0  ;;  %s2376_s30 = smov 0   ;;  %s2378_s10 = smov 0  }
   0x9   :  { %s2380_s11 = smov 0   ;;  %s2382_s12 = smov 0  }
   0xa   :  { %s2384_s13 = smov 0   ;;  %s2386_s14 = smov 0  }
   0xb   :  { %s2388_s15 = smov 0   ;;  %s2390_s16 = smov 0  }
   0xc   :  { %s2392_s17 = smov 0   ;;  %s2394_s18 = smov 0  }
   0xd   :  { %s2396_s19 = smov 0  }
   0xe LB: > { %2887 = sst [smem:[#allocation8_spill]] %s2270_s30  ;;  %s1784_s20 = sadd.s32 4294967295, %s2310_s19   ;;  %s2310_s19 = sphi %s2396_s19, %s25_s19   ;;  %s2306_s18 = sphi %s2394_s18, %s2929_s18   ;;  %s2302_s17 = sphi %s2392_s17, %s2928_s17   ;;  %s2298_s16 = sphi %s2390_s16, %s2927_s16   ;;  %s2294_s15 = sphi %s2388_s15, %s2926_s15   ;;  %s2290_s14 = sphi %s2386_s14, %s2925_s14   ;;  %s2286_s13 = sphi %s2384_s13, %s2924_s13   ;;  %s2282_s12 = sphi %s2382_s12, %s2923_s12   ;;  %s2278_s11 = sphi %s2380_s11, %s2922_s11   ;;  %s2274_s10 = sphi %s2378_s10, %s2921_s10   ;;  %s2270_s30 = sphi %s2376_s30, %s2920_s30  }
   0xf   : > { %2888 = sst [smem:[#allocation9_spill]] %s2274_s10  ;;  %s1785_s21 = sadd.s32 4294967294, %s2310_s19  }
  0x10   : > { %2889 = sst [smem:[#allocation10_spill]] %s2278_s11  ;;  %s34_s22 = sadd.s32 1, %s2302_s17 }
  0x11   : > { %2890 = sst [smem:[#allocation11_spill]] %s2286_s13  ;;  %s37_s23 = sadd.s32 1, %s2306_s18 }
  0x12   : > { %2891 = sst [smem:[#allocation12_spill]] %s2290_s14  ;;  %p35_p0 = scmp.ge.s32.totalorder %s34_s22, 2 }
  0x13   : > { %2892 = sst [smem:[#allocation13_spill]] %s2302_s17  ;;  %s148_s24 = sadd.s32 1, %s2290_s14 }
  0x14   : > { %2893 = sst [smem:[#allocation14_spill]] %s2306_s18  ;;  %p155_p1 = scmp.ne.s32.totalorder %s2290_s14, %s2286_s13 }
  0x15   : > { %2894 = sst [smem:[#allocation15_spill]] %s2310_s19  ;;  %p156_p2 = scmp.eq.s32.totalorder %s2310_s19, 0 }
  0x16   : > { %s2931_s22 = smov (%p35_p0, %s34_s22), 0  ;;  %s2933_s23 = smov (!%p35_p0, %s37_s23), %s2306_s18 }
  0x17   : > { %2895 = sst [smem:[#allocation16_spill]] %s2931_s22  ;;  %s145_s25 = ssub.s32 %s2302_s17, %s2931_s22 }
  0x18   : > { %p2442_p3 = por %p156_p2, %p155_p1  ;;  %p39_p4 = scmp.ge.s32.totalorder %s2933_s23, 2 }
  0x19   : > { %p146_p5 = scmp.eq.s32.totalorder %s145_s25, 0  ;;  %p161_p6 = scmp.ne.s32.totalorder %s2286_s13, %s2282_s12 }
  0x1a   : > { %p162_p7 = scmp.eq.s32.totalorder %s1784_s20, 0  ;;  %s2935_s23 = smov (%p39_p4, %s2933_s23), 0 }
  0x1b   : > { %2897 = sst [smem:[#allocation17_spill]] %s2935_s23  ;;  %s275_s29 = ssub.s32 %s2306_s18, %s2935_s23 }
  0x1c   : > { %s2450_s27 = scalar_select %p146_p5, %s2290_s14, %s148_s24  }
  0x1d   : > { %p2452_p8 = por %p162_p7, %p161_p6  ;;  %p276_p9 = scmp.eq.s32.totalorder %s275_s29, 0 }
  0x1e   : > { %2898 = sst [smem:[#allocation18_spill]] %s2450_s27  ;;  %s278_s22 = sadd.s32 1, %s2278_s11 }
  0x1f   : > { %p288_p10 = scmp.ne.s32.totalorder %s2278_s11, %s2274_s10  ;;  %p289_p11 = scmp.eq.s32.totalorder %s1784_s20, 3 }
  0x20   : > { %s2462_s25 = scalar_select %p276_p9, %s2278_s11, %s278_s22  }
  0x21   : > { %p2464_p12 = por %p289_p11, %p288_p10  ;;  %p294_p13 = scmp.ne.s32.totalorder %s2274_s10, %s2270_s30 }
  0x22   : > { %2900 = sst [smem:[#allocation19_spill]] %s2462_s25  ;;  %p295_p0 = scmp.eq.s32.totalorder %s1785_s21, 3 }
  0x23   : > { %s2901_s12 = scalar_select %p2464_p12, 1, 0 }
  0x24   : > { %p2006_p1 = scmp.lt.s32.totalorder %s2310_s19, 4  ;;  %s349_s24 = sand.u32 1, %s2290_s14  }
  0x25   : > { %2902 = sst [smem:[#allocation20_spill]] %s2901_s12  ;;  %p2472_p2 = por %p295_p0, %p294_p13 }
  0x26   : > { %s1788_s23 = sshll.u32 %s349_s24, 4  ;;  %s1852_s29 = sshll.u32 %s2302_s17, 8 }
  0x27   : > { %s2903_s27 = scalar_select %p2472_p2, 1, 0 }
  0x28   : > { %s2905_s4 = sld [smem:[#allocation24_spill]]  ;;  %s353_s22 = scalar_lea.vmem [#allocation2], %s1788_s23 }
  0x29   : > { %2904 = sst [smem:[#allocation21_spill]] %s2903_s27  ;;  %s360_s25 = sshll.u32 %s353_s22, 4  ;;  %s2488_s25 = int_to_ptr.vmem [resolvable:$true] %s360_s25 }
  0x2a   : > { %p2484_p4 = pnand %p2006_p1, %p2442_p3  ;;  %s2490_s17 = scalar_lea.sflag [#allocation3], %s349_s24 }
  0x2c   : > { %p2160_p6 = pneg %p2484_p4 }
  0x2e   : > { %s2480_s20 = scalar_lea.hbm %s2905_s4, %s1852_s29  ;;  %s2163_s26 = scalar_lea.hbm %s2905_s4, 512 }
  0x2f   : > { %s2158_s9 = scalar_lea.hbm %s2480_s20, 256  ;;  %p2164_p3 = scmp.lt.u32.totalorder %s2480_s20, %s2905_s4 }
  0x30   : > { %p2159_p5 = scmp.ne.s32.totalorder %s2480_s20, %s2158_s9  ;;  %p2165_p10 = scmp.lt.u32.totalorder %s2163_s26, %s2158_s9 }
  0x31   : > { %p2167_p13 = scmp.lt.u32.totalorder %s2158_s9, %s2480_s20 }
  0x32   : > { %p2161_p7 = pnand %p2160_p6, %p2159_p5  ;;  %p2166_p11 = por %p2165_p10, %p2164_p3 }
  0x34   : > { %p2162_p9 = pneg %p2161_p7  ;;  %p2168_p0 = por %p2167_p13, %p2166_p11 }
  0x36   : > { %p2169_p1 = pnand %p2168_p0, %p2162_p9 }
  0x38   : > { %2172 = shalt.err (!%p2169_p1)
}
  0x39   : > { %s2173_s24 = scalar_lea.vmem %s2488_s25, 256  ;;  %s2312_s18 = smov [#allocation2]  }
  0x3a   : > { %p2174_p5 = scmp.ne.s32.totalorder %s2488_s25, %s2173_s24  ;;  %s2178_s23 = sshll.u32 %s2312_s18, 4  ;;  %s2179_s23 = int_to_ptr.vmem [resolvable:$false] %s2178_s23 }
  0x3b   : > { %s2180_s29 = scalar_lea.vmem %s2179_s23, 512  ;;  %p2181_p12 = scmp.lt.s32.totalorder %s2488_s25, %s2179_s23 }
  0x3c   : > { %p2176_p7 = pnand %p2174_p5, %p2160_p6  ;;  %p2182_p3 = scmp.lt.s32.totalorder %s2180_s29, %s2173_s24 }
  0x3e   : > { %p2177_p2 = pneg %p2176_p7  ;;  %p2183_p10 = por %p2182_p3, %p2181_p12 }
  0x40   : > { %p2184_p11 = pnand %p2183_p10, %p2177_p2 }
  0x42   : > { %2187 = shalt.err (!%p2184_p11)
}
  0x43   : > { %s2313_s9 = smov 64   ;;  %s2314_s26 = smov 4  }
  0x44   : > { %2001 = dma.hbm_to_vmem [thread:$0]  (!%p2484_p4), %s2480_s20, 256, %s2488_s25, %s2490_s17, %s2313_s9, %s2313_s9, %s2314_s26  }
  0x45   : > { %p1791_p6 = scmp.ge.s32.totalorder %s2310_s19, 1  ;;  %p398_p9 = scmp.lt.s32.totalorder %s2310_s19, 5 }
  0x47   : > { %p399_p13 = pnand %p1791_p6, %p398_p9 }
  0x48   : > { %s404_s22 = sand.u32 (!%p399_p13), 1, %s2286_s13  }
  0x49   : > { %402 = sbr.rel (%p399_p13) target bundleno = 3287 (0xcd7), region = 56  ;;  %s2521_s24 = sshll.u32 (!%p399_p13), %s404_s22, 4 }
  0x4a   : > { %s405_s18 = scalar_lea.sflag (!%p399_p13), [#allocation3], %s404_s22 }
  0x50   : > { %2261 = dma.done.wait (%p2452_p8), %s405_s18, 256  }
  0x51   : > { %2263 = vsyncadd (%p2452_p8), %s405_s18, 4294967040  ;;  %s2872_s17 = sand.u32 1, %s2274_s10   ;;  %s1794_s25 = sshll.u32 %s2298_s16, 1 }
  0x52   : > { %s1793_s20 = sshll.u32 %s2872_s17, 4  ;;  %p481_p12 = scmp.lt.s32.totalorder %s1794_s25, 3 }
  0x53   : > { %p497_p2 = scmp.lt.s32.totalorder %s2294_s15, 1  ;;  %s2907_s1 = sld [smem:[#allocation23_spill]] }
  0x54   : > { %s2937_s25 = smov (!%p481_p12, %s1794_s25), 3  ;;  %s2908_s0 = sld [smem:[#allocation22_spill]] }
  0x55   : > { %s2534_s21 = scalar_select %p497_p2, %s2294_s15, 1 }
  0x56   : > { %s1795_s28 = sshll.u32 %s2937_s25, 3  ;;  %s2574_s27 = scalar_lea.vmem [#allocation5], %s1793_s20 }
  0x57   : > { %s2547_s14 = scalar_lea.vmem %s2858_s2, %s1795_s28  ;;  %s1853_s13 = sshll.u32 %s2534_s21, 4 }
  0x58   : > { %s1993_s11 = smul.u32 48, %s2534_s21  ;;  %s501_s19 = scalar_lea.vmem %s2859_s3, %s1853_s13 }
  0x59   : > { %s2539_s26 = scalar_lea.vmem %s2907_s1, %s2937_s25  ;;  %s1854_s12 = sshll.u32 %s2534_s21, 5 }
  0x5a   : > { %s484_s23 = scalar_lea.vmem %s2908_s0, %s1795_s28  ;;  %s2558_s25 = scalar_lea.vmem %s2861_s5, %s1993_s11 }
  0x5b   : > { %s2563_s18 = scalar_lea.vmem %s2862_s6, %s1854_s12  ;;  %s2568_s28 = scalar_lea.vmem %s2863_s7, %s1853_s13 }
  0x5c   : > { %s519_s30 = scalar_lea.vmem %s2864_s8, %s2534_s21  ;;  %p1806_p8 = scmp.ne.s32.totalorder %s2294_s15, 0 }
  0x5d   : > { %v526_v0 = vld [vmem:[%s484_s23] sm:$0xff] (!%p1806_p8)  ;;  %vm528_vm0 = vcmask (!%p1806_p8), 261120   ;;  %v527_v1 = vld [vmem:[%s484_s23 + $0x8] sm:$0xff] (!%p1806_p8) }
  0x5e   : > { %525 = sbr.rel (%p1806_p8) target bundleno = 101 (0x65), region = 64  ;;  %529 = vst.msk [vmem:[%s2574_s27] sm:$0xff] (!%p1806_p8), %vm528_vm0, %v526_v0  ;;  %530 = vst.msk [vmem:[%s2574_s27 + $0x8] sm:$0xff] (!%p1806_p8), %vm528_vm0, %v527_v1 }
  0x65 PF: > { %v2120_v2 = vld [vmem:[%s501_s19] sm:$0xff]   ;;  %v602_v3 = vlaneseq  ;;  %v2315_v4 = vmov 0.0   ;;  %v2121_v5 = vld [vmem:[%s501_s19 + $0x8] sm:$0xff]   ;;  %vm2316_vm1 = vmmov 0   ;;  %vm557_vm2 = vcmask 261120   ;;  %s2317_s0 = smov 32  }
  0x66   : > { %1893 = vmatprep.subr.bf16.mxu0 %v2315_v4  ;;  %1901 = vmatprep.subr.bf16.mxu1 %v2315_v4  ;;  %v2584_v6 = vld [vmem:[%s2574_s27] sm:$0xff]  ;;  %v2587_v7 = vld [vmem:[%s2574_s27 + $0x8] sm:$0xff]  ;;  %s2318_s1 = smov 112   ;;  %s2319_s10 = smov 96   ;;  %vm649_vm3 = vcmask 130048   ;;  %vm755_vm4 = vcmask 64512  }
  0x67   : > { %1894 = vmatpush3.bf16.msra.mxu0 %v2120_v2  ;;  %1897 = vmatprep.mubr.msk.bf16.mxu0 %vm2316_vm1, %v2315_v4  ;;  %v2590_v8 = vld [vmem:[%s2568_s28] sm:$0xff]  ;;  %v2592_v9 = vshrl.u32 %v602_v3, 7  ;;  %v540_v11 = vpack.c.bf16 %v2587_v7, %v2584_v6  ;;  %s2320_s11 = smov 64   ;;  %vm786_vm5 = vcmask 1043456   ;;  %s2909_s13 = scalar_lea.vmem [#allocation2], %s2521_s24  ;;  %vm1507_vm8 = vcmask 523264  }
  0x68   : > { %1895 = vmatprep.subr.bf16.mxu0 %v2315_v4  ;;  %1903 = vmatprep.mubr.msk.bf16.mxu1 %vm2316_vm1, %v2315_v4  ;;  %v1812_v40 = vld [vmem:[%s2539_s26] ss:$0 sm:$0xff]  ;;  %s2910_s15 = smov %s2909_s13  ;;  %s2321_s19 = smov 16  }
  0x69   : > { %v610_v10 = vsub.s32 1, %v2592_v9  ;;  %v604_v13 = vsub.s32 0, %v2592_v9  ;;  %v620_v25 = vsub.s32 2, %v2592_v9  ;;  %s2911_s24 = sld [smem:[#allocation9_spill]]  ;;  %s2912_s23 = sld [smem:[#allocation20_spill]] }
  0x6a   : > { %s1856_s20 = sshll.u32 %s2298_s16, 8  ;;  %s1610_s21 = sshll.u32 %s2574_s27, 4  ;;  %s2788_s21 = int_to_ptr.vmem [resolvable:$true] %s1610_s21 }
  0x6b   : > { %1896 = vmatpush3.bf16.msra.mxu0 %v2121_v5  ;;  %v611_v12 = vrot.slane %v2590_v8, %v610_v10  ;;  %v605_v16 = vrot.slane %v2590_v8, %v604_v13  ;;  %v621_v29 = vrot.slane %v2590_v8, %v620_v25  ;;  %s2323_s4 = smov [#allocation5]  }
  0x6c   : > { %1907 = vmatprep.subr.bf16.mxu0 %v2315_v4  ;;  %s2192_s17 = sshll.u32 %s2323_s4, 4  ;;  %s2193_s17 = int_to_ptr.vmem [resolvable:$false] %s2192_s17 }
  0x6d   : > { %613 = vrot.lane.b32.xlu0 %v611_v12, %s2317_s0  ;;  %p2195_p7 = scmp.lt.s32.totalorder %s2788_s21, %s2193_s17 }
  0x6e   : > { %1898 = vmatmul.mubr.msk.bf16.vlgmr.msra.gmra.mrb[0].mxu0 %vm557_vm2, %v540_v11 }
  0x6f   : > { %1909 = vmatprep.mubr.msk.bf16.mxu0 %vm2316_vm1, %v2315_v4  ;;  %s2914_s22 = sand.u32 1, %s2911_s24   ;;  %p2915_p0 = scmp.ne.s32.totalorder %s2912_s23, 0 }
  0x70   : > { %s2795_s16 = scalar_lea.sflag [#allocation4], %s2914_s22 }
  0xdf   : > { %v614_v14 = vpop.permute.xlu0 %613 }
 0x141   : > { %v595_v15 = vpop.f32.mrb[0].mxu0 }
 0x142   : > { %v616_v17 = vadd.f32 %v614_v14, %v595_v15  ;;  %v1899_v18 = vpop.f32.mrb[1].mxu0  ;;  %v606_v27 = vadd.f32 %v605_v16, %v595_v15 }
 0x143   : > { %v2607_v19 = vpop.f32.mrb[2].mxu0 }
 0x144   : > { %v2610_v20 = vadd.f32 %v605_v16, %v2607_v19  ;;  %635 = vrot.lane.b32.xlu0 %v616_v17, %s2318_s1  ;;  %v1900_v21 = vpop.f32.mrb[3].mxu0  ;;  %v638_v22 = vpack.c.bf16 %v616_v17, %v616_v17  ;;  %v632_v30 = vpack.c.bf16 %v606_v27, %v606_v27  ;;  %v617_v36 = vadd.f32 %v614_v14, %v2607_v19 }
 0x146   : > { %v894_v12 = vpack.c.bf16 %v617_v36, %v617_v36 }
 0x148   : > { %647 = vrot.lane.b32.xlu0 %v638_v22, %s2319_s10 }
 0x1b6   : > { %v636_v23 = vpop.permute.xlu0 %635 }
 0x1b7   : > { %v639_v24 = vpack.c.bf16 %v636_v23, %v636_v23 }
 0x1b9   : > { %697 = vrot.lane.b32.xlu1 %v639_v24, %s2319_s10 }
 0x1ba   : > { %v648_v26 = vpop.permute.xlu0 %647 }
 0x1bb   : > { %v654_v28 = vsel %vm649_vm3, %v648_v26, 0 }
 0x1bc   : > { %1902 = vmatpush3.bf16.xpose.msra.mxu1 %v654_v28 }
 0x1bd   : > { %629 = vrot.lane.b32.xlu1 %v606_v27, %s2318_s1  ;;  %1913 = vmatprep.subr.bf16.mxu1 %v2315_v4 }
 0x1c1   : > { %623 = vrot.lane.b32.xlu1 %v621_v29, %s2320_s11 }
 0x1c3   : > { %1904 = vmatmul.mubr.msk.bf16.vlgmr.msra.gmra.mrb[0].mxu1 %vm649_vm3, %v632_v30 }
 0x1c4   : > { %1915 = vmatprep.mubr.msk.bf16.mxu1 %vm2316_vm1, %v2315_v4 }
 0x22b   : > { %v698_v31 = vpop.permute.xlu1 %697 }
 0x22c   : > { %v703_v32 = vsel %vm649_vm3, %v698_v31, 0 }
 0x22d   : > { %1908 = vmatpush3.bf16.xpose.msra.mxu0 %v703_v32  ;;  %v888_v32 = vpack.c.bf16 %v2610_v20, %v2610_v20 }
 0x22e   : > { %1919 = vmatprep.subr.bf16.mxu0 %v2315_v4 }
 0x22f   : > { %v630_v33 = vpop.permute.xlu1 %629 }
 0x230   : > { %v633_v34 = vpack.c.bf16 %v630_v33, %v630_v33 }
 0x233   : > { %v624_v35 = vpop.permute.xlu1 %623 }
 0x234   : > { %v626_v37 = vadd.f32 %v624_v35, %v595_v15  ;;  %1910 = vmatmul.mubr.msk.bf16.vlgmr.msra.gmra.mrb[4].mxu0 %vm649_vm3, %v633_v34  ;;  %v2637_v62 = vadd.f32 %v624_v35, %v2607_v19 }
 0x235   : > { %1921 = vmatprep.mubr.msk.bf16.mxu0 %vm2316_vm1, %v2315_v4 }
 0x236   : > { %v2108_v38 = vpack.i.bf16 %v617_v36, %v626_v37  ;;  %v644_v11 = vpack.c.bf16 %v626_v37, %v626_v37 }
 0x238   : > { %2109 = vrot.lane.b32.xlu1 %v2108_v38, %s2318_s1 }
 0x296   : > { %v690_v39 = vpop.f32.mrb[0].mxu1 }
 0x297   : > { %v745_v41 = vmul.f32 0.25, %v690_v39  ;;  %v1905_v42 = vpop.f32.mrb[1].mxu1 }
 0x298   : > { %v693_v43 = vpop.f32.mrb[2].mxu1  ;;  %v1817_v42 = vld [vmem:[%s2539_s26 + $0x1] ss:$0 sm:$0xff] }
 0x299   : > { %v1906_v44 = vpop.f32.mrb[3].mxu1  ;;  %v753_v45 = vadd.f32 %v1812_v40, %v745_v41 }
 0x29b   : > { %v756_v46 = vsel %vm755_vm4, %v753_v45, -inf }
 0x29c   : > { %757 = vmax.xlane.f32.xlu1 %v756_v46 }
 0x2aa   : > { %v2110_v47 = vpop.permute.xlu1 %2109 }
 0x2ab   : > { %v2112_v48 = vunpack.i.h.bf16 %v2110_v47  ;;  %v2111_v5 = vunpack.i.l.bf16 %v2110_v47 }
 0x2ad   : > { %v895_v49 = vpack.c.bf16 %v2112_v48, %v2112_v48  ;;  %v645_v10 = vpack.c.bf16 %v2111_v5, %v2111_v5  ;;  %v900_v5 = vpack.c.bf16 %v2637_v62, %v2637_v62 }
 0x2af   : > { %952 = vrot.lane.b32.xlu1 %v895_v49, %s2319_s10 }
 0x307   : > { %v739_v50 = vpop.f32.mrb[4].mxu0 }
 0x308   : > { %v746_v51 = vmul.f32 0.25, %v739_v50  ;;  %v1911_v52 = vpop.f32.mrb[5].mxu0 }
 0x309   : > { %v742_v53 = vpop.f32.mrb[6].mxu0 }
 0x30a   : > { %v1912_v54 = vpop.f32.mrb[7].mxu0  ;;  %v754_v55 = vadd.f32 %v1812_v40, %v746_v51 }
 0x30c   : > { %v759_v56 = vsel %vm755_vm4, %v754_v55, -inf }
 0x30d   : > { %760 = vmax.xlane.f32.xlu0 %v759_v56 }
 0x329   : > { %v758_v57 = vpop.xlane.xlu1 %757 }
 0x32a   : > { %v762_v58 = vsub.f32 %v753_v45, %v758_v57 }
 0x32c   : > { %v764_v59 = vmul.f32 1.442695, %v762_v58 }
 0x32d   : > { %v953_v13 = vpop.permute.xlu1 %952 }
 0x32e   : > { %2134 = vpow2.f32 %v764_v59  ;;  %v958_v28 = vsel %vm649_vm3, %v953_v13, 0 }
 0x338   : > { %v2135_v60 = vpop.eup %2134 }
 0x339   : > { %v768_v61 = vsel %vm755_vm4, %v2135_v60, 0.0 }
 0x33a   : > { %769 = vadd.xlane.f32.xlu1 %v768_v61 }
 0x34b   : > { %897 = vrot.lane.b32.xlu1 %v2637_v62, %s2318_s1 }
 0x39a   : > { %v761_v63 = vpop.xlane.xlu0 %760 }
 0x39b   : > { %v763_v0 = vsub.f32 %v754_v55, %v761_v63 }
 0x39d   : > { %v766_v1 = vmul.f32 1.442695, %v763_v0 }
 0x39f   : > { %2136 = vpow2.f32 %v766_v1 }
 0x3a9   : > { %v2137_v2 = vpop.eup %2136 }
 0x3aa   : > { %v771_v3 = vsel %vm755_vm4, %v2137_v2, 0.0 }
 0x3ab   : > { %772 = vadd.xlane.f32.xlu0 %v771_v3 }
 0x3c1   : > { %831 = vrot.lane.b32.xlu0 %v645_v10, %s2320_s11 }
 0x3c5   : > { %885 = vrot.lane.b32.xlu0 %v2610_v20, %s2318_s1 }
 0x3c7   : > { %v770_v14 = vpop.xlane.xlu1 %769 }
 0x3c8   : > { %2138 = vrcp.f32 %v770_v14 }
 0x3c9   : > { %781 = vrot.lane.b32.xlu0 %v644_v11, %s2320_s11 }
 0x3cd   : > { %903 = vrot.lane.b32.xlu0 %v894_v12, %s2319_s10 }
 0x3d2   : > { %v2139_v18 = vpop.eup %2138 }
 0x3d3   : > { %v776_v22 = vmul.f32 %v2139_v18, %v2135_v60 }
 0x3d5   : > { %v778_v27 = vpack.c.bf16 %v776_v22, %v776_v22  ;;  %v2122_v22 = vld [vmem:[%s2909_s13] sm:$0xff]  }
 0x438   : > { %v773_v15 = vpop.xlane.xlu0 %772 }
 0x439   : > { %2140 = vrcp.f32 %v773_v15 }
 0x43c   : > { %v832_v16 = vpop.permute.xlu0 %831 }
 0x43d   : > { %v837_v17 = vsel %vm786_vm5, %v832_v16, 0 }
 0x43e   : > { %1920 = vmatpush3.bf16.msra.mxu0 %v837_v17 }
 0x43f   : > { %1931 = vmatprep.subr.bf16.mxu0 %v2315_v4 }
 0x440   : > { %v886_v19 = vpop.permute.xlu0 %885 }
 0x441   : > { %v889_v30 = vpack.c.bf16 %v886_v19, %v886_v19 }
 0x443   : > { %v2141_v21 = vpop.eup %2140 }
 0x444   : > { %v777_v23 = vmul.f32 %v2141_v21, %v2137_v2  ;;  %v782_v24 = vpop.permute.xlu0 %781  ;;  %v898_v2 = vpop.permute.xlu1 %897 }
 0x445   : > { %v788_v25 = vsel %vm786_vm5, %v782_v24, 0  ;;  %v901_v3 = vpack.c.bf16 %v898_v2, %v898_v2 }
 0x446   : > { %1914 = vmatpush3.bf16.msra.mxu1 %v788_v25  ;;  %v779_v26 = vpack.c.bf16 %v777_v23, %v777_v23  ;;  %v2123_v23 = vld [vmem:[%s2910_s15 + $0x8] sm:$0xff]  }
 0x447   : > { %1925 = vmatprep.subr.bf16.mxu1 %v2315_v4 }
 0x448   : > { %1922 = vmatmul.mubr.msk.bf16.vlgmr.msra.gmra.mrb[8].mxu0 %vm755_vm4, %v779_v26  ;;  %v904_v29 = vpop.permute.xlu0 %903 }
 0x449   : > { %1932 = vmatpush3.bf16.xpose.msra.mxu0 %v958_v28  ;;  %1916 = vmatmul.mubr.msk.bf16.vlgmr.msra.gmra.mrb[4].mxu1 %vm755_vm4, %v778_v27  ;;  %v909_v31 = vsel %vm649_vm3, %v904_v29, 0 }
 0x44a   : > { %1933 = vmatprep.mubr.msk.bf16.mxu0 %vm2316_vm1, %v2315_v4  ;;  %1927 = vmatprep.mubr.msk.bf16.mxu1 %vm2316_vm1, %v2315_v4 }
 0x44b   : > { %1943 = vmatprep.subr.bf16.mxu0 %v2315_v4 }
 0x44f   : > { %1926 = vmatpush3.bf16.xpose.msra.mxu1 %v909_v31 }
 0x450   : > { %1934 = vmatmul.mubr.msk.bf16.vlgmr.msra.gmra.mrb[12].mxu0 %vm649_vm3, %v889_v30  ;;  %1937 = vmatprep.subr.bf16.mxu1 %v2315_v4 }
 0x451   : > { %1945 = vmatprep.mubr.msk.bf16.mxu0 %vm2316_vm1, %v2315_v4 }
 0x456   : > { %1928 = vmatmul.mubr.msk.bf16.vlgmr.msra.gmra.mrb[8].mxu1 %vm649_vm3, %v888_v32 }
 0x457   : > { %1939 = vmatprep.mubr.msk.bf16.mxu1 %vm2316_vm1, %v2315_v4 }
 0x51b   : > { %v2669_v33 = vpop.f32.mrb[8].mxu0 }
 0x51c   : > { %v2671_v34 = vpop.f32.mrb[4].mxu1  ;;  %v1923_v35 = vpop.f32.mrb[9].mxu0 }
 0x51d   : > { %v1917_v36 = vpop.f32.mrb[5].mxu1  ;;  %v876_v37 = vpop.f32.mrb[10].mxu0 }
 0x51e   : > { %v827_v38 = vpop.f32.mrb[6].mxu1  ;;  %v1924_v39 = vpop.f32.mrb[11].mxu0 }
 0x51f   : > { %v1918_v40 = vpop.f32.mrb[7].mxu1 }
 0x523   : > { %v994_v41 = vpop.f32.mrb[12].mxu0 }
 0x524   : > { %v1001_v43 = vmul.f32 0.25, %v994_v41  ;;  %v1935_v44 = vpop.f32.mrb[13].mxu0 }
 0x525   : > { %v997_v20 = vpop.f32.mrb[14].mxu0 }
 0x526   : > { %v1936_v45 = vpop.f32.mrb[15].mxu0  ;;  %v1009_v46 = vadd.f32 %v1817_v42, %v1001_v43 }
 0x528   : > { %v1013_v47 = vsel %vm755_vm4, %v1009_v46, -inf }
 0x529   : > { %v945_v48 = vpop.f32.mrb[8].mxu1  ;;  %1014 = vmax.xlane.f32.xlu0 %v1013_v47 }
 0x52a   : > { %v1000_v49 = vmul.f32 0.25, %v945_v48  ;;  %v1929_v50 = vpop.f32.mrb[9].mxu1 }
 0x52b   : > { %v948_v51 = vpop.f32.mrb[10].mxu1  ;;  %v2322_v50 = vmov 0  }
 0x52c   : > { %v1930_v52 = vpop.f32.mrb[11].mxu1  ;;  %v1008_v53 = vadd.f32 %v1817_v42, %v1000_v49  ;;  %2118 = vset.pattern.permute.xlu1 %v2322_v50  ;;  %2119 = vset.pattern.permute.xlu0 %v2322_v50  ;;  %v534_v51 = vld [vmem:[%s2547_s14 + $0x8] sm:$0xff] }
 0x52e   : > { %v1010_v54 = vsel %vm755_vm4, %v1008_v53, -inf }
 0x52f   : > { %1011 = vmax.xlane.f32.xlu0 %v1010_v54 }
 0x5b6   : > { %v1015_v55 = vpop.xlane.xlu0 %1014 }
 0x5b7   : > { %v1017_v56 = vsub.f32 %v1009_v46, %v1015_v55 }
 0x5b9   : > { %v1020_v57 = vmul.f32 1.442695, %v1017_v56 }
 0x5bb   : > { %2142 = vpow2.f32 %v1020_v57 }
 0x5bc   : > { %v1012_v58 = vpop.xlane.xlu0 %1011 }
 0x5bd   : > { %v1016_v59 = vsub.f32 %v1008_v53, %v1012_v58 }
 0x5bf   : > { %v1018_v60 = vmul.f32 1.442695, %v1016_v59 }
 0x5c1   : > { %2144 = vpow2.f32 %v1018_v60  ;;  %v533_v60 = vld [vmem:[%s2547_s14] sm:$0xff] }
 0x5c5   : > { %v2143_v61 = vpop.eup %2142 }
 0x5c6   : > { %v1025_v63 = vsel %vm755_vm4, %v2143_v61, 0.0 }
 0x5c7   : > { %1026 = vadd.xlane.f32.xlu0 %v1025_v63  ;;  %v2125_v63 = vld [vmem:[%s2558_s25] sm:$0xff]  }
 0x5cb   : > { %v2145_v0 = vpop.eup %2144 }
 0x5cc   : > { %v1022_v1 = vsel %vm755_vm4, %v2145_v0, 0.0 }
 0x5cd   : > { %1023 = vadd.xlane.f32.xlu1 %v1022_v1  ;;  %v2127_v1 = vld [vmem:[%s2558_s25 + $0x8] sm:$0xff]  }
 0x5dd   : > { %1084 = vrot.lane.b32.xlu0 %v901_v3, %s2320_s11 }
 0x5e1   : > { %1035 = vrot.lane.b32.xlu0 %v900_v5, %s2320_s11 }
 0x654   : > { %v1027_v10 = vpop.xlane.xlu0 %1026 }
 0x655   : > { %2146 = vrcp.f32 %v1027_v10 }
 0x658   : > { %v1085_v11 = vpop.permute.xlu0 %1084 }
 0x659   : > { %v1090_v12 = vsel %vm786_vm5, %v1085_v11, 0 }
 0x65a   : > { %v1024_v13 = vpop.xlane.xlu1 %1023  ;;  %1944 = vmatpush3.bf16.msra.mxu0 %v1090_v12 }
 0x65b   : > { %2148 = vrcp.f32 %v1024_v13  ;;  %1957 = vmatprep.subr.bf16.mxu0 %v2315_v4  ;;  %v1233_v13 = vsub.s32 4, %v2592_v9 }
 0x65c   : > { %v1036_v14 = vpop.permute.xlu0 %1035 }
 0x65d   : > { %v1041_v15 = vsel %vm786_vm5, %v1036_v14, 0  ;;  %v1239_v14 = vsub.s32 5, %v2592_v9 }
 0x65e   : > { %1938 = vmatpush3.bf16.msra.mxu1 %v1041_v15  ;;  %v1234_v15 = vrot.slane %v2590_v8, %v1233_v13 }
 0x65f   : > { %v2147_v16 = vpop.eup %2146  ;;  %1949 = vmatprep.subr.bf16.mxu1 %v2315_v4 }
 0x660   : > { %v1031_v62 = vmul.f32 %v2147_v16, %v2143_v61  ;;  %v2124_v61 = vld [vmem:[%s2558_s25 + $0x10] sm:$0xff]  }
 0x662   : > { %v1033_v17 = vpack.c.bf16 %v1031_v62, %v1031_v62 }
 0x664   : > { %1946 = vmatmul.mubr.msk.bf16.vlgmr.msra.gmra.mrb[16].mxu0 %vm755_vm4, %v1033_v17  ;;  %v1240_v17 = vrot.slane %v2590_v8, %v1239_v14 }
 0x665   : > { %v2149_v18 = vpop.eup %2148  ;;  %1961 = vmatprep.mubr.msk.bf16.mxu0 %vm2316_vm1, %v2315_v4  ;;  %1958 = vmatpush3.bf16.msra.mxu0 %v2124_v61 }
 0x666   : > { %v1030_v19 = vmul.f32 %v2149_v18, %v2145_v0  ;;  %1959 = vmatprep.subr.bf16.mxu0 %v2315_v4  ;;  %v2126_v0 = vld [vmem:[%s2558_s25 + $0x18] sm:$0xff]  }
 0x668   : > { %v1032_v21 = vpack.c.bf16 %v1030_v19, %v1030_v19 }
 0x669   : > { %1960 = vmatpush3.bf16.msra.mxu0 %v2126_v0 }
 0x66a   : > { %1940 = vmatmul.mubr.msk.bf16.vlgmr.msra.gmra.mrb[12].mxu1 %vm755_vm4, %v1032_v21  ;;  %1973 = vmatprep.subr.bf16.mxu0 %v2315_v4 }
 0x66b   : > { %1953 = vmatprep.mubr.msk.bf16.mxu1 %vm2316_vm1, %v2315_v4  ;;  %1950 = vmatpush3.bf16.msra.mxu1 %v2122_v22 }
 0x66c   : > { %1951 = vmatprep.subr.bf16.mxu1 %v2315_v4 }
 0x66f   : > { %1952 = vmatpush3.bf16.msra.mxu1 %v2123_v23 }
 0x670   : > { %1965 = vmatprep.subr.bf16.mxu1 %v2315_v4 }
 0x737   : > { %v1126_v24 = vpop.f32.mrb[16].mxu0 }
 0x738   : > { %v2113_v25 = vpack.i.bf16 %v1126_v24, %v2669_v33  ;;  %v1947_v26 = vpop.f32.mrb[17].mxu0  ;;  %v1144_v33 = vsub.s32 3, %v2592_v9 }
 0x739   : > { %v1129_v27 = vpop.f32.mrb[18].mxu0  ;;  %v1259_v26 = vadd.s32 4294967295, %v2592_v9 }
 0x73a   : > { %2114 = vrot.lane.b32.xlu0 %v2113_v25, %s2321_s19  ;;  %v1948_v28 = vpop.f32.mrb[19].mxu0  ;;  %v1145_v41 = vrot.slane %v2590_v8, %v1144_v33 }
 0x73b   : > { %vm1260_vm6 = vcmp.ge.s32.totalorder %v1259_v26, 0 }
 0x73d   : > { %v1077_v29 = vpop.f32.mrb[12].mxu1 }
 0x73e   : > { %v1941_v30 = vpop.f32.mrb[13].mxu1 }
 0x73f   : > { %v1080_v31 = vpop.f32.mrb[14].mxu1 }
 0x740   : > { %v1942_v32 = vpop.f32.mrb[15].mxu1  ;;  %v2128_v31 = vld [vmem:[%s2558_s25 + $0x20] sm:$0xff]  }
 0x741   : > { %v1390_v32 = vadd.s32 1, %v2592_v9 }
 0x743   : > { %vm1392_vm7 = vcmp.lt.s32.totalorder %v1390_v32, 8 }
 0x7ac   : > { %v2115_v35 = vpop.permute.xlu0 %2114 }
 0x7ad   : > { %v2117_v36 = vunpack.i.h.bf16 %v2115_v35  ;;  %v2116_v37 = vunpack.i.l.bf16 %v2115_v35 }
 0x7af   : > { %v1136_v38 = vsel %vm649_vm3, %v1077_v29, %v2117_v36  ;;  %v883_v39 = vsel %vm649_vm3, %v2671_v34, %v2116_v37 }
 0x7b0   : > { %v1137_v40 = vpack.c.bf16 %v1136_v38, %v883_v39 }
 0x7b2   : > { %1954 = vmatmul.mubr.msk.bf16.vlgmr.msra.gmra.mrb[16].mxu1 %vm557_vm2, %v1137_v40 }
 0x7b3   : > { %1969 = vmatprep.mubr.msk.bf16.mxu1 %vm2316_vm1, %v2315_v4  ;;  %1966 = vmatpush3.bf16.msra.mxu1 %v2125_v63 }
 0x7b4   : > { %1967 = vmatprep.subr.bf16.mxu1 %v2315_v4 }
 0x7b7   : > { %1968 = vmatpush3.bf16.msra.mxu1 %v2127_v1 }
 0x7b8   : > { %1981 = vmatprep.subr.bf16.mxu1 %v2315_v4 }
 0x885   : > { %v1195_v42 = vpop.f32.mrb[16].mxu1 }
 0x886   : > { %v1196_v43 = vadd.f32 %v1195_v42, %v1145_v41  ;;  %v1955_v44 = vpop.f32.mrb[17].mxu1 }
 0x887   : > { %v1198_v20 = vpop.f32.mrb[18].mxu1 }
 0x888   : > { %v1199_v45 = vadd.f32 %v1198_v20, %v1145_v41  ;;  %v1956_v46 = vpop.f32.mrb[19].mxu1  ;;  %v1202_v47 = vadd.f32 %v1196_v43, %v2584_v6  ;;  %v2129_v41 = vld [vmem:[%s2558_s25 + $0x28] sm:$0xff]   ;;  %v2130_v20 = vld [vmem:[%s2563_s18] sm:$0xff]   ;;  %s2913_s25 = sld [smem:[#allocation25_spill]] }
 0x889   : > { %v2132_v46 = vld [vmem:[%s2563_s18 + $0x10] sm:$0xff]  }
 0x88a   : > { %v1204_v34 = vsel %vm557_vm2, %v1202_v47, 0.0  ;;  %v1203_v48 = vadd.f32 %v1199_v45, %v2587_v7  ;;  %v2131_v45 = vld [vmem:[%s2563_s18 + $0x8] sm:$0xff]  }
 0x88b   : > { %1205 = vadd.xlane.f32.xlu0 %v1204_v34 }
 0x88c   : > { %v1207_v49 = vsel %vm557_vm2, %v1203_v48, 0.0 }
 0x88d   : > { %1208 = vadd.xlane.f32.xlu1 %v1207_v49 }
 0x88e   : > { %s2786_s9 = scalar_lea.hbm %s2913_s25, %s1856_s20 }
 0x8a1   : > { %1250 = vperm.xlu0 %2119, %v534_v51  }
 0x918   : > { %v1206_v52 = vpop.xlane.xlu0 %1205 }
 0x919   : > { %v1211_v53 = vmul.f32 0.03125, %v1206_v52 }
 0x91a   : > { %v1209_v54 = vpop.xlane.xlu1 %1208 }
 0x91b   : > { %v1213_v6 = vsub.f32 %v1202_v47, %v1211_v53  ;;  %v1212_v55 = vmul.f32 0.03125, %v1209_v54  ;;  %v2133_v47 = vld [vmem:[%s2563_s18 + $0x18] sm:$0xff]   ;;  %s2188_s18 = scalar_lea.vmem %s2788_s21, 256 }
 0x91c   : > { %p2189_p4 = scmp.ne.s32.totalorder %s2788_s21, %s2188_s18 }
 0x91d   : > { %v1214_v56 = vsub.f32 %v1203_v48, %v1212_v55  ;;  %v1215_v7 = vmul.f32 %v1213_v6, %v1213_v6 }
 0x91e   : > { %p2190_p1 = pnand %p2189_p4, %p2915_p0 }
 0x91f   : > { %v1217_v57 = vsel %vm557_vm2, %v1215_v7, 0.0  ;;  %v1216_v58 = vmul.f32 %v1214_v56, %v1214_v56 }
 0x920   : > { %1218 = vadd.xlane.f32.xlu1 %v1217_v57  ;;  %v2733_v27 = vpop.permute.xlu0 %1250  ;;  %p2191_p5 = pneg %p2190_p1 }
 0x921   : > { %v1220_v59 = vsel %vm557_vm2, %v1216_v58, 0.0 }
 0x924   : > { %1221 = vadd.xlane.f32.xlu1 %v1220_v59 }
 0x935   : > { %1245 = vperm.xlu1 %2118, %v533_v60  }
 0x9ad   : > { %v1219_v2 = vpop.xlane.xlu1 %1218 }
 0x9ae   : > { %v1223_v3 = vmul.f32 0.03125, %v1219_v2 }
 0x9b0   : > { %v1225_v5 = vadd.f32 1e-05, %v1223_v3  ;;  %v1481_v3 = vsub.s32 6, %v2592_v9 }
 0x9b1   : > { %v1222_v10 = vpop.xlane.xlu1 %1221 }
 0x9b2   : > { %2150 = vrsqrt.f32 %v1225_v5  ;;  %v1224_v11 = vmul.f32 0.03125, %v1222_v10  ;;  %v1482_v5 = vrot.slane %v2590_v8, %v1481_v3 }
 0x9b4   : > { %v1226_v12 = vadd.f32 1e-05, %v1224_v11 }
 0x9b5   : > { %v2727_v21 = vpop.permute.xlu1 %1245 }
 0x9b6   : > { %2152 = vrsqrt.f32 %v1226_v12 }
 0x9bc   : > { %v2151_v16 = vpop.eup %2150 }
 0x9bd   : > { %v1229_v62 = vmul.f32 %v2151_v16, %v1213_v6 }
 0x9bf   : > { %v1235_v18 = vmul.f32 %v1234_v15, %v1229_v62 }
 0x9c0   : > { %v2153_v19 = vpop.eup %2152 }
 0x9c1   : > { %v1241_v22 = vadd.f32 %v1240_v17, %v1235_v18  ;;  %v1230_v23 = vmul.f32 %v2153_v19, %v1214_v56  ;;  %v1840_v56 = vld [vmem:[%s519_s30] ss:$0 sm:$0xff] }
 0x9c3   : > { %v2730_v24 = vmul.f32 %v2727_v21, %v1241_v22  ;;  %v1236_v25 = vmul.f32 %v1234_v15, %v1230_v23 }
 0x9c5   : > { %v1242_v28 = vadd.f32 %v1240_v17, %v1236_v25  ;;  %v1257_v29 = vrot.slane %v2730_v24, 7  ;;  %v1388_v40 = vrot.slane %v2730_v24, 1 }
 0x9c7   : > { %v2737_v30 = vmul.f32 %v2733_v27, %v1242_v28  ;;  %v1263_v38 = vsel %vm1260_vm6, %v1257_v29, 0.0  ;;  %v1394_v43 = vsel %vm1392_vm7, %v1388_v40, 0.0  ;;  %v1582_v40 = vsub.s32 7, %v2592_v9 }
 0x9c9   : > { %v1258_v35 = vrot.slane %v2737_v30, 7  ;;  %v1270_v36 = vpack.c.bf16 %v2737_v30, %v2730_v24  ;;  %v1389_v37 = vrot.slane %v2737_v30, 1 }
 0x9cb   : > { %v1264_v39 = vsel %vm1260_vm6, %v1258_v35, 0.0  ;;  %1962 = vmatmul.mubr.msk.bf16.vlgmr.msra.gmra.mrb[20].mxu0 %vm557_vm2, %v1270_v36  ;;  %v1395_v42 = vsel %vm1392_vm7, %v1389_v37, 0.0 }
 0x9cc   : > { %1974 = vmatpush3.bf16.msra.mxu0 %v2128_v31  ;;  %v1265_v33 = vpack.c.bf16 %v1264_v39, %v1263_v38  ;;  %1977 = vmatprep.mubr.msk.bf16.mxu0 %vm2316_vm1, %v2315_v4  ;;  %v1396_v44 = vpack.c.bf16 %v1395_v42, %v1394_v43  ;;  %v1846_v43 = vld [vmem:[%s2568_s28 + $0x8] ss:$0 sm:$0xff]  ;;  %s2194_s28 = scalar_lea.vmem %s2193_s17, 512 }
 0x9cd   : > { %1975 = vmatprep.subr.bf16.mxu0 %v2315_v4  ;;  %p2196_p3 = scmp.lt.s32.totalorder %s2194_s28, %s2188_s18 }
 0x9ce   : > { %1970 = vmatmul.mubr.msk.bf16.vlgmr.msra.gmra.mrb[20].mxu1 %vm557_vm2, %v1265_v33  ;;  %v1583_v33 = vrot.slane %v2590_v8, %v1582_v40 }
 0x9cf   : > { %1989 = vmatprep.mubr.msk.bf16.mxu1 %vm2316_vm1, %v2315_v4  ;;  %1982 = vmatpush3.bf16.msra.mxu1 %v2130_v20  ;;  %p2197_p10 = por %p2196_p3, %p2195_p7 }
 0x9d0   : > { %1976 = vmatpush3.bf16.msra.mxu0 %v2129_v41  ;;  %1983 = vmatprep.subr.bf16.mxu1 %v2315_v4 }
 0x9d1   : > { %p2198_p11 = pnand %p2197_p10, %p2191_p5 }
 0x9d3   : > { %1978 = vmatmul.mubr.msk.bf16.vlgmr.msra.gmra.mrb[24].mxu0 %vm557_vm2, %v1396_v44  ;;  %1984 = vmatpush3.bf16.msra.mxu1 %v2131_v45 }
 0x9d4   : > { %1985 = vmatprep.subr.bf16.mxu1 %v2315_v4 }
 0x9d7   : > { %1986 = vmatpush3.bf16.msra.mxu1 %v2132_v46 }
 0x9d8   : > { %1987 = vmatprep.subr.bf16.mxu1 %v2315_v4 }
 0x9db   : > { %1988 = vmatpush3.bf16.msra.mxu1 %v2133_v47 }
 0xa9e   : > { %v1325_v34 = vpop.f32.mrb[20].mxu0 }
 0xa9f   : > { %v1963_v48 = vpop.f32.mrb[21].mxu0 }
 0xaa0   : > { %v1328_v49 = vpop.f32.mrb[22].mxu0 }
 0xaa1   : > { %v1964_v50 = vpop.f32.mrb[23].mxu0  ;;  %v1381_v51 = vpop.f32.mrb[20].mxu1 }
 0xaa2   : > { %v1382_v52 = vadd.f32 %v1381_v51, %v1325_v34  ;;  %v1971_v53 = vpop.f32.mrb[21].mxu1 }
 0xaa3   : > { %v1384_v54 = vpop.f32.mrb[22].mxu1 }
 0xaa4   : > { %v1385_v6 = vadd.f32 %v1384_v54, %v1328_v49  ;;  %v1972_v55 = vpop.f32.mrb[23].mxu1 }
 0xaa6   : > { %v1451_v7 = vpop.f32.mrb[24].mxu0 }
 0xaa7   : > { %v1458_v57 = vadd.f32 %v1451_v7, %v1382_v52  ;;  %v1979_v4 = vpop.f32.mrb[25].mxu0 }
 0xaa8   : > { %v1454_v58 = vpop.f32.mrb[26].mxu0 }
 0xaa9   : > { %v1466_v59 = vadd.f32 %v1840_v56, %v1458_v57  ;;  %v1459_v60 = vadd.f32 %v1454_v58, %v1385_v6  ;;  %v1980_v61 = vpop.f32.mrb[27].mxu0 }
 0xaab   : > { %v1467_v63 = vadd.f32 %v1840_v56, %v1459_v60  ;;  %v1468_v0 = vmax.f32 %v1466_v59, 0.0 }
 0xaad   : > { %v1469_v1 = vmax.f32 %v1467_v63, 0.0 }
 0xaaf   : > { %v1470_v2 = vpack.c.bf16 %v1469_v1, %v1468_v0 }
 0xab1   : > { %1990 = vmatmul.mubr.msk.bf16.vlgmr.msra.gmra.mrb[24].mxu1 %vm1507_vm8, %v1470_v2 }
 0xb84   : > { %v1545_v10 = vpop.f32.mrb[24].mxu1 }
 0xb85   : > { %v1546_v11 = vadd.f32 %v1545_v10, %v1482_v5  ;;  %v1991_v12 = vpop.f32.mrb[25].mxu1 }
 0xb86   : > { %v1548_v13 = vpop.f32.mrb[26].mxu1 }
 0xb87   : > { %v1549_v14 = vadd.f32 %v1548_v13, %v1482_v5  ;;  %v1992_v15 = vpop.f32.mrb[27].mxu1  ;;  %v1552_v16 = vadd.f32 %v1546_v11, %v2730_v24 }
 0xb89   : > { %v1554_v62 = vsel %vm557_vm2, %v1552_v16, 0.0  ;;  %v1553_v17 = vadd.f32 %v1549_v14, %v2737_v30 }
 0xb8a   : > { %1555 = vadd.xlane.f32.xlu1 %v1554_v62 }
 0xb8b   : > { %v1557_v18 = vsel %vm557_vm2, %v1553_v17, 0.0 }
 0xb8e   : > { %1558 = vadd.xlane.f32.xlu1 %v1557_v18 }
 0xc17   : > { %v1556_v19 = vpop.xlane.xlu1 %1555 }
 0xc18   : > { %v1560_v22 = vmul.f32 0.03125, %v1556_v19 }
 0xc1a   : > { %v1562_v23 = vsub.f32 %v1552_v16, %v1560_v22 }
 0xc1b   : > { %v1559_v25 = vpop.xlane.xlu1 %1558 }
 0xc1c   : > { %v1561_v26 = vmul.f32 0.03125, %v1559_v25  ;;  %v1564_v28 = vmul.f32 %v1562_v23, %v1562_v23 }
 0xc1e   : > { %v1563_v29 = vsub.f32 %v1553_v17, %v1561_v26  ;;  %v1566_v31 = vsel %vm557_vm2, %v1564_v28, 0.0 }
 0xc1f   : > { %1567 = vadd.xlane.f32.xlu0 %v1566_v31 }
 0xc20   : > { %v1565_v24 = vmul.f32 %v1563_v29, %v1563_v29 }
 0xc22   : > { %v1569_v32 = vsel %vm557_vm2, %v1565_v24, 0.0 }
 0xc23   : > { %1570 = vadd.xlane.f32.xlu1 %v1569_v32 }
 0xcac   : > { %v1568_v30 = vpop.xlane.xlu0 %1567 }
 0xcad   : > { %v1572_v35 = vmul.f32 0.03125, %v1568_v30 }
 0xcaf   : > { %v1574_v36 = vadd.f32 1e-05, %v1572_v35 }
 0xcb0   : > { %v1571_v37 = vpop.xlane.xlu1 %1570 }
 0xcb1   : > { %2154 = vrsqrt.f32 %v1574_v36  ;;  %v1573_v38 = vmul.f32 0.03125, %v1571_v37 }
 0xcb3   : > { %v1575_v39 = vadd.f32 1e-05, %v1573_v38 }
 0xcb5   : > { %2156 = vrsqrt.f32 %v1575_v39 }
 0xcbb   : > { %v2155_v41 = vpop.eup %2154 }
 0xcbc   : > { %v1578_v42 = vmul.f32 %v2155_v41, %v1562_v23 }
 0xcbe   : > { %v1584_v44 = vmul.f32 %v1583_v33, %v1578_v42 }
 0xcbf   : > { %v2157_v20 = vpop.eup %2156 }
 0xcc0   : > { %v1590_v45 = vadd.f32 %v1846_v43, %v1584_v44  ;;  %v1579_v46 = vmul.f32 %v2157_v20, %v1563_v29 }
 0xcc2   : > { %v1585_v47 = vmul.f32 %v1583_v33, %v1579_v46  ;;  %v1592_v34 = vmul.f32 %v1590_v45, %v2727_v21 }
 0xcc4   : > { %v1591_v48 = vadd.f32 %v1846_v43, %v1585_v47  ;;  %1594 = vst.msk [vmem:[%s2574_s27] sm:$0xff] %vm557_vm2, %v1592_v34 }
 0xcc6   : > { %v1593_v8 = vmul.f32 %v1591_v48, %v2733_v27 }
 0xcc8   : > { %1595 = vst.msk [vmem:[%s2574_s27 + $0x8] sm:$0xff] %vm557_vm2, %v1593_v8 }
 0xcc9   : > { %2201 = shalt.err (!%p2198_p11)
}
 0xcca   : > { %s2202_s30 = scalar_lea.hbm %s2786_s9, 256  ;;  %s2206_s1 = scalar_lea.hbm %s2913_s25, 512 }
 0xccb   : > { %p2203_p6 = scmp.ne.s32.totalorder %s2786_s9, %s2202_s30  ;;  %p2207_p12 = scmp.lt.u32.totalorder %s2786_s9, %s2913_s25 }
 0xccc   : > { %p2208_p2 = scmp.lt.u32.totalorder %s2206_s1, %s2202_s30  ;;  %p2210_p4 = scmp.lt.u32.totalorder %s2202_s30, %s2786_s9 }
 0xccd   : > { %p2204_p9 = pnand %p2203_p6, %p2915_p0 }
 0xcce   : > { %p2209_p8 = por %p2208_p2, %p2207_p12 }
 0xccf   : > { %p2205_p13 = pneg %p2204_p9 }
 0xcd0   : > { %p2211_p1 = por %p2210_p4, %p2209_p8 }
 0xcd2   : > { %p2212_p5 = pnand %p2211_p1, %p2205_p13 }
 0xcd4   : > { %2215 = shalt.err (!%p2212_p5)
}
 0xcd5   : > { %s2324_s13 = smov 128   ;;  %s2325_s15 = smov 8  }
 0xcd6   : > { %1996 = dma.vmem_to_hbm [thread:$0]  (%p2915_p0), %s2788_s21, 256, %s2786_s9, %s2795_s16, %s2324_s13, %s2324_s13, %s2325_s15  }
 0xcd7 PF: > { %s2916_s19 = sld [smem:[#allocation15_spill]]  ;;  %s2917_s14 = sld [smem:[#allocation8_spill]] }
 0xcd8   : > { %s2918_s12 = sld [smem:[#allocation21_spill]] }
 0xcdd   : > { %p2007_p7 = scmp.ge.s32.totalorder %s2916_s19, 2  ;;  %s1625_s24 = sand.u32 1, %s2917_s14  }
 0xcde   : > { %p2919_p3 = scmp.ne.s32.totalorder %s2918_s12, 0  ;;  %s1626_s20 = scalar_lea.sflag [#allocation4], %s1625_s24 }
 0xce0   : > { %p2003_p10 = pnand %p2007_p7, %p2919_p3 }
 0xce2   : > { %2265 = dma.done.wait (!%p2003_p10), %s1626_s20, 256  }
 0xce3   : > { %2267 = vsyncadd (!%p2003_p10), %s1626_s20, 4294967040  ;;  %s25_s19 = sadd.s32 1, %s2916_s19   ;;  %s2920_s30 = sld [smem:[#allocation9_spill]] }
 0xce4   : > { %p22_p11 = scmp.ge.s32.totalorder %s25_s19, 6   ;;  %s2921_s10 = sld [smem:[#allocation10_spill]] }
 0xce5   : > { %s2922_s11 = sld [smem:[#allocation19_spill]]  ;;  %s2923_s12 = sld [smem:[#allocation11_spill]] }
 0xce6   : > { %s2924_s13 = sld [smem:[#allocation12_spill]]  ;;  %s2925_s14 = sld [smem:[#allocation18_spill]] }
 0xce7   : > { %s2926_s15 = sld [smem:[#allocation13_spill]]  ;;  %s2927_s16 = sld [smem:[#allocation14_spill]] }
 0xce8   : > { %s2928_s17 = sld [smem:[#allocation16_spill]]  ;;  %s2929_s18 = sld [smem:[#allocation17_spill]] }
 0xce9   :  { %24 = sbr.rel (!%p22_p11) target bundleno = 14 (0xe), region = 131 }
 0xcf0   :  { %1631 = vsyncpa [#allocation3], 1 }
 0xcf1   :  { %1633 = vsyncpa [#allocation3 + $0x1], 1 }
 0xcf2   :  { %1634 = vsyncpa [#allocation4], 1 }
 0xcf3   :  { %1636 = vsyncpa [#allocation4 + $0x1], 1 }

</bundles_post_ra>
